<compile_context>
chip_gen: v7x
topology: tpu7x:2x2x1
jax: 0.10.0
libtpu: 0.0.40
codegen_flags: <defaults>
</compile_context>

<pallas_src>
import math

import jax
import jax.numpy as jnp
from jax import lax
from jax.experimental import pallas as pl
from jax.experimental.pallas import tpu as pltpu

HALF_LOG_2PI = 0.5 * math.log(2.0 * math.pi)


def _round_up(x, m):
    return ((x + m - 1) // m) * m


def _make_mix_kl_kernel(d, ny, b_imp, n_imp, off_y, off_ub, off_xi, alpha, gamma):
    """Builds the fused kernel; all shape/loss constants are compile-time."""
    alpha = float(alpha)
    gamma = float(gamma)
    m = b_imp * n_imp
    const = float(d) * HALF_LOG_2PI          # logical D, not the padded lane count

    def kernel(packed_ref, out_ref):
        # ---- static row slices of the single packed VMEM input ----
        p = packed_ref[0:8, :]               # rows 0..3 = s, b, mu, log_sigma
        s = p[0:1, :]
        b = p[1:2, :]
        mu = p[2:3, :]
        ls = p[3:4, :]

        sum_s = jnp.sum(s)                   # padded lanes are zero -> exact
        sum_ls = jnp.sum(ls)
        inv_sig = jnp.exp(-ls)
        exp_s = jnp.exp(s)
        exp_neg_s = jnp.exp(-s)

        def proposal_logp(x):                # (R, Dp) -> (R, 1)
            return -0.5 * jnp.sum(x * x, axis=-1, keepdims=True) - const

        def target_logp(x):                  # (R, Dp) -> (R, 1)
            z = (x - mu) * inv_sig
            return -0.5 * jnp.sum(z * z, axis=-1, keepdims=True) - sum_ls - const

        # ---------------- forward KL: flow.inverse(y) ----------------
        y = packed_ref[off_y:off_y + ny, :]
        u = (y - b) * exp_neg_s
        minus_log_jac = -sum_s
        prop_u = proposal_logp(u)
        est_f = jnp.mean(target_logp(y) - prop_u - minus_log_jac)
        grad_f = jnp.mean(-prop_u - minus_log_jac)

        # ---------------- backward KL: flow(u_b) ----------------
        ub = packed_ref[off_ub:off_ub + ny, :]
        xb = ub * exp_s + b
        tgt_xb = target_logp(xb)
        est_b = jnp.mean(proposal_logp(ub) - sum_s - tgt_xb)
        grad_b = jnp.mean(-sum_s - tgt_xb)
        grad_b = jnp.where(jnp.isnan(grad_b), 0.0, grad_b)   # torch isnan guard

        # -------- importance-weighted forward KL (flattened rows) --------
        xi = packed_ref[off_xi:off_xi + m, :]        # (M, Dp), M = B*N
        # Three per-row log-probs, sequenced so only one big temporary is live
        # alongside xi at any time.
        lp_prop_xi = proposal_logp(xi)               # (M, 1)
        lp_tgt_xi = target_logp(xi)                  # (M, 1)
        x_inv = (xi - b) * exp_neg_s                 # flow.inverse(x)
        lp_prop_xinv = proposal_logp(x_inv)          # (M, 1)

        log_w = lp_tgt_xi - lp_prop_xi               # (M, 1)
        minus_log_q = -lp_prop_xinv + sum_s          # (M, 1): minus_log_jac = -sum_s

        # Per-B softmax over groups of n_imp consecutive rows, expressed on a
        # (M, B) group-mask matrix (lane b <-> batch b): only broadcasts plus
        # lane/sublane reductions, no in-kernel reshape/relayout.
        row = lax.broadcasted_iota(jnp.int32, (m, b_imp), 0)
        col = lax.broadcasted_iota(jnp.int32, (m, b_imp), 1)
        in_grp = jnp.logical_and(row >= col * n_imp, row < (col + 1) * n_imp)

        lw_mb = jnp.where(in_grp, log_w, -jnp.inf)              # (M, B)
        max_b = jnp.max(lw_mb, axis=0, keepdims=True)           # (1, B)
        w_mb = jnp.where(in_grp, jnp.exp(lw_mb - max_b), 0.0)   # (M, B)
        sum_b = jnp.sum(w_mb, axis=0, keepdims=True)            # (1, B)
        w_mb = w_mb / sum_b
        w_mb = jnp.where(jnp.isnan(w_mb), 0.0, w_mb)            # weight[w != w] = 0
        resum_b = jnp.sum(w_mb, axis=0, keepdims=True)
        w_mb = jnp.where(resum_b == 0.0,                        # weight[sum==0] = 1
                         jnp.where(in_grp, 1.0, 0.0), w_mb)

        kl = jnp.sum(w_mb * minus_log_q) / float(m)             # torch .mean() over B*N

        # ---------------- fused mix (gamma is not None in MixKLLoss) ----------------
        loss = alpha * est_f + (1.0 - alpha) * est_b + gamma * kl
        grad_loss = alpha * grad_f + (1.0 - alpha) * grad_b + gamma * kl

        # Single lane-dense (1,128) store: lane 0 = loss, lane 1 = grad_loss.
        lane = lax.broadcasted_iota(jnp.int32, (1, 128), 1)
        out_ref[...] = jnp.where(lane == 0, loss,
                                 jnp.where(lane == 1, grad_loss, 0.0)
                                 ).astype(jnp.float32)

    return kernel


def mix_kl_loss(y, u_b, x_imp, s, b, mu, log_sigma,
                alpha=0.99, beta=0.0, gamma=0.99):
    """Returns (loss, grad_loss) exactly as MixKLLoss.forward does.

    alpha/beta/gamma are static Python floats baked into the kernel; beta is
    unused by mix_kl and kept only for API compatibility.
    """
    ny, d = y.shape
    b_imp, n_imp, _ = x_imp.shape
    m = b_imp * n_imp

    d_pad = _round_up(d, 128)      # full-lane reductions; zero padding is exact
    ny_pad = _round_up(ny, 8)      # 8-row (sublane) aligned section starts
    m_pad = _round_up(m, 8)

    off_y = 8
    off_ub = off_y + ny_pad
    off_xi = off_ub + ny_pad
    rows = off_xi + m_pad

    f32 = jnp.float32
    # Single packed input: [s;b;mu;log_sigma | pad | y | pad | u_b | pad | x_imp | pad]
    packed = jnp.concatenate([
        s, b, mu, log_sigma,
        jnp.zeros((off_y - 4, d), f32),
        y, jnp.zeros((ny_pad - ny, d), f32),
        u_b, jnp.zeros((ny_pad - ny, d), f32),
        x_imp.reshape(m, d), jnp.zeros((m_pad - m, d), f32),
    ], axis=0).astype(f32)
    packed = jnp.pad(packed, ((0, 0), (0, d_pad - d)))          # (rows, d_pad)

    cost = pl.CostEstimate(
        flops=8 * (2 * ny + 3 * m) * d_pad + 12 * m * b_imp,
        transcendentals=3 * d_pad + m * b_imp,
        bytes_accessed=4 * (rows * d_pad + 128),
    )

    vmem = pl.BlockSpec(memory_space=pltpu.MemorySpace.VMEM)
    out = pl.pallas_call(
        _make_mix_kl_kernel(d, ny, b_imp, n_imp, off_y, off_ub, off_xi,
                            alpha, gamma),
        out_shape=jax.ShapeDtypeStruct((1, 128), jnp.float32),
        in_specs=[vmem],
        out_specs=vmem,
        cost_estimate=cost,
    )(packed)

    res = out[0, :2]               # one post-kernel slice
    return res[0], res[1]


if __name__ == "__main__":
    D = 32        # feature dimension of y
    NY = 8        # batch of y samples
    B_IMP = 10    # importance_forward_kl batch_size (default 10)
    N_IMP = 10    # importance_forward_kl N          (default 10)

    key = jax.random.PRNGKey(0)
    k_y, k_ub, k_xi, k_s, k_b, k_mu, k_ls = jax.random.split(key, 7)

    # Deterministic synthetic "parameters" of flow / target.
    s = 0.1 * jax.random.normal(k_s, (1, D), dtype=jnp.float32)
    b = 0.5 * jax.random.normal(k_b, (1, D), dtype=jnp.float32)
    mu = jax.random.normal(k_mu, (1, D), dtype=jnp.float32)
    log_sigma = 0.1 * jax.random.normal(k_ls, (1, D), dtype=jnp.float32)

    # Inputs: y and the proposal samples used by backward / importance KL.
    y = jax.random.normal(k_y, (NY, D), dtype=jnp.float32)
    u_b = jax.random.normal(k_ub, (NY, D), dtype=jnp.float32)              # proposal.sample(y.shape[:-1])
    x_imp = jax.random.normal(k_xi, (B_IMP, N_IMP, D), dtype=jnp.float32)  # proposal.sample((10, 10))

    loss, grad_loss = jax.jit(mix_kl_loss)(y, u_b, x_imp, s, b, mu, log_sigma)
    jax.block_until_ready((loss, grad_loss))
    print("KERNEL_OK")
</pallas_src>

<mosaic_0001>
module attributes {stable_mosaic.version = 11 : i64} {
  func.func @kernel(%arg0: memref<128x128xf32, #tpu.memory_space<vmem>>, %arg1: memref<1x128xf32, #tpu.memory_space<vmem>>) attributes {dimension_semantics = [], scalar_prefetch = 0 : i64, scratch_operands = 0 : i64, tpu.core_type = #tpu.core_type<tc>} {
    %c0 = arith.constant 0 : index
    %c0_0 = arith.constant 0 : index
    %0 = vector.load %arg0[%c0, %c0_0] : memref<128x128xf32, #tpu.memory_space<vmem>>, vector<8x128xf32>
    %1 = vector.extract_strided_slice %0 {offsets = [0, 0], sizes = [1, 128], strides = [1, 1]} : vector<8x128xf32> to vector<1x128xf32>
    %2 = vector.extract_strided_slice %0 {offsets = [1, 0], sizes = [1, 128], strides = [1, 1]} : vector<8x128xf32> to vector<1x128xf32>
    %3 = vector.extract_strided_slice %0 {offsets = [2, 0], sizes = [1, 128], strides = [1, 1]} : vector<8x128xf32> to vector<1x128xf32>
    %4 = vector.extract_strided_slice %0 {offsets = [3, 0], sizes = [1, 128], strides = [1, 1]} : vector<8x128xf32> to vector<1x128xf32>
    %5 = vector.shape_cast %1 : vector<1x128xf32> to vector<1x1x128xf32>
    %cst = arith.constant dense<0.000000e+00> : vector<1xf32>
    %6 = vector.multi_reduction <add>, %5, %cst [1, 2] : vector<1x1x128xf32> to vector<1xf32>
    %7 = vector.shape_cast %6 : vector<1xf32> to vector<1x1x1xf32>
    %8 = vector.extract %7[0, 0, 0] : f32 from vector<1x1x1xf32>
    %9 = vector.shape_cast %4 : vector<1x128xf32> to vector<1x1x128xf32>
    %cst_1 = arith.constant dense<0.000000e+00> : vector<1xf32>
    %10 = vector.multi_reduction <add>, %9, %cst_1 [1, 2] : vector<1x1x128xf32> to vector<1xf32>
    %11 = vector.shape_cast %10 : vector<1xf32> to vector<1x1x1xf32>
    %12 = vector.extract %11[0, 0, 0] : f32 from vector<1x1x1xf32>
    %cst_2 = arith.constant 0.000000e+00 : f32
    %13 = vector.broadcast %cst_2 : f32 to vector<1x128xf32>
    %14 = arith.subf %13, %4 : vector<1x128xf32>
    %15 = math.exp %14 : vector<1x128xf32>
    %16 = math.exp %1 : vector<1x128xf32>
    %cst_3 = arith.constant 0.000000e+00 : f32
    %17 = vector.broadcast %cst_3 : f32 to vector<1x128xf32>
    %18 = arith.subf %17, %1 : vector<1x128xf32>
    %19 = math.exp %18 : vector<1x128xf32>
    %c8 = arith.constant 8 : index
    %c0_4 = arith.constant 0 : index
    %20 = vector.load %arg0[%c8, %c0_4] : memref<128x128xf32, #tpu.memory_space<vmem>>, vector<8x128xf32>
    %21 = vector.broadcast %2 : vector<1x128xf32> to vector<8x128xf32>
    %22 = arith.subf %20, %21 : vector<8x128xf32>
    %23 = vector.broadcast %19 : vector<1x128xf32> to vector<8x128xf32>
    %24 = arith.mulf %22, %23 : vector<8x128xf32>
    %cst_5 = arith.constant 0.000000e+00 : f32
    %25 = arith.subf %cst_5, %8 : f32
    %26 = arith.mulf %24, %24 : vector<8x128xf32>
    %cst_6 = arith.constant dense<0.000000e+00> : vector<8xf32>
    %27 = vector.multi_reduction <add>, %26, %cst_6 [1] : vector<8x128xf32> to vector<8xf32>
    %28 = vector.shape_cast %27 : vector<8xf32> to vector<8x1xf32>
    %cst_7 = arith.constant -5.000000e-01 : f32
    %29 = vector.broadcast %cst_7 : f32 to vector<8x1xf32>
    %30 = arith.mulf %29, %28 : vector<8x1xf32>
    %cst_8 = arith.constant 29.4060326 : f32
    %31 = vector.broadcast %cst_8 : f32 to vector<8x1xf32>
    %32 = arith.subf %30, %31 : vector<8x1xf32>
    %33 = vector.broadcast %3 : vector<1x128xf32> to vector<8x128xf32>
    %34 = arith.subf %20, %33 : vector<8x128xf32>
    %35 = vector.broadcast %15 : vector<1x128xf32> to vector<8x128xf32>
    %36 = arith.mulf %34, %35 : vector<8x128xf32>
    %37 = arith.mulf %36, %36 : vector<8x128xf32>
    %cst_9 = arith.constant dense<0.000000e+00> : vector<8xf32>
    %38 = vector.multi_reduction <add>, %37, %cst_9 [1] : vector<8x128xf32> to vector<8xf32>
    %39 = vector.shape_cast %38 : vector<8xf32> to vector<8x1xf32>
    %cst_10 = arith.constant -5.000000e-01 : f32
    %40 = vector.broadcast %cst_10 : f32 to vector<8x1xf32>
    %41 = arith.mulf %40, %39 : vector<8x1xf32>
    %42 = vector.broadcast %12 : f32 to vector<8x1xf32>
    %43 = arith.subf %41, %42 : vector<8x1xf32>
    %cst_11 = arith.constant 29.4060326 : f32
    %44 = vector.broadcast %cst_11 : f32 to vector<8x1xf32>
    %45 = arith.subf %43, %44 : vector<8x1xf32>
    %46 = arith.subf %45, %32 : vector<8x1xf32>
    %47 = vector.broadcast %25 : f32 to vector<8x1xf32>
    %48 = arith.subf %46, %47 : vector<8x1xf32>
    %49 = vector.shape_cast %48 : vector<8x1xf32> to vector<1x8x1xf32>
    %cst_12 = arith.constant dense<0.000000e+00> : vector<1xf32>
    %50 = vector.multi_reduction <add>, %49, %cst_12 [1, 2] : vector<1x8x1xf32> to vector<1xf32>
    %51 = vector.shape_cast %50 : vector<1xf32> to vector<1x1x1xf32>
    %52 = vector.extract %51[0, 0, 0] : f32 from vector<1x1x1xf32>
    %cst_13 = arith.constant 8.000000e+00 : f32
    %53 = arith.divf %52, %cst_13 : f32
    %cst_14 = arith.constant 0.000000e+00 : f32
    %54 = vector.broadcast %cst_14 : f32 to vector<8x1xf32>
    %55 = arith.subf %54, %32 : vector<8x1xf32>
    %56 = vector.broadcast %25 : f32 to vector<8x1xf32>
    %57 = arith.subf %55, %56 : vector<8x1xf32>
    %58 = vector.shape_cast %57 : vector<8x1xf32> to vector<1x8x1xf32>
    %cst_15 = arith.constant dense<0.000000e+00> : vector<1xf32>
    %59 = vector.multi_reduction <add>, %58, %cst_15 [1, 2] : vector<1x8x1xf32> to vector<1xf32>
    %60 = vector.shape_cast %59 : vector<1xf32> to vector<1x1x1xf32>
    %61 = vector.extract %60[0, 0, 0] : f32 from vector<1x1x1xf32>
    %cst_16 = arith.constant 8.000000e+00 : f32
    %62 = arith.divf %61, %cst_16 : f32
    %c16 = arith.constant 16 : index
    %c0_17 = arith.constant 0 : index
    %63 = vector.load %arg0[%c16, %c0_17] : memref<128x128xf32, #tpu.memory_space<vmem>>, vector<8x128xf32>
    %64 = vector.broadcast %16 : vector<1x128xf32> to vector<8x128xf32>
    %65 = arith.mulf %63, %64 : vector<8x128xf32>
    %66 = vector.broadcast %2 : vector<1x128xf32> to vector<8x128xf32>
    %67 = arith.addf %65, %66 : vector<8x128xf32>
    %68 = vector.broadcast %3 : vector<1x128xf32> to vector<8x128xf32>
    %69 = arith.subf %67, %68 : vector<8x128xf32>
    %70 = vector.broadcast %15 : vector<1x128xf32> to vector<8x128xf32>
    %71 = arith.mulf %69, %70 : vector<8x128xf32>
    %72 = arith.mulf %71, %71 : vector<8x128xf32>
    %cst_18 = arith.constant dense<0.000000e+00> : vector<8xf32>
    %73 = vector.multi_reduction <add>, %72, %cst_18 [1] : vector<8x128xf32> to vector<8xf32>
    %74 = vector.shape_cast %73 : vector<8xf32> to vector<8x1xf32>
    %cst_19 = arith.constant -5.000000e-01 : f32
    %75 = vector.broadcast %cst_19 : f32 to vector<8x1xf32>
    %76 = arith.mulf %75, %74 : vector<8x1xf32>
    %77 = vector.broadcast %12 : f32 to vector<8x1xf32>
    %78 = arith.subf %76, %77 : vector<8x1xf32>
    %cst_20 = arith.constant 29.4060326 : f32
    %79 = vector.broadcast %cst_20 : f32 to vector<8x1xf32>
    %80 = arith.subf %78, %79 : vector<8x1xf32>
    %81 = arith.mulf %63, %63 : vector<8x128xf32>
    %cst_21 = arith.constant dense<0.000000e+00> : vector<8xf32>
    %82 = vector.multi_reduction <add>, %81, %cst_21 [1] : vector<8x128xf32> to vector<8xf32>
    %83 = vector.shape_cast %82 : vector<8xf32> to vector<8x1xf32>
    %cst_22 = arith.constant -5.000000e-01 : f32
    %84 = vector.broadcast %cst_22 : f32 to vector<8x1xf32>
    %85 = arith.mulf %84, %83 : vector<8x1xf32>
    %cst_23 = arith.constant 29.4060326 : f32
    %86 = vector.broadcast %cst_23 : f32 to vector<8x1xf32>
    %87 = arith.subf %85, %86 : vector<8x1xf32>
    %88 = vector.broadcast %8 : f32 to vector<8x1xf32>
    %89 = arith.subf %87, %88 : vector<8x1xf32>
    %90 = arith.subf %89, %80 : vector<8x1xf32>
    %91 = vector.shape_cast %90 : vector<8x1xf32> to vector<1x8x1xf32>
    %cst_24 = arith.constant dense<0.000000e+00> : vector<1xf32>
    %92 = vector.multi_reduction <add>, %91, %cst_24 [1, 2] : vector<1x8x1xf32> to vector<1xf32>
    %93 = vector.shape_cast %92 : vector<1xf32> to vector<1x1x1xf32>
    %94 = vector.extract %93[0, 0, 0] : f32 from vector<1x1x1xf32>
    %cst_25 = arith.constant 8.000000e+00 : f32
    %95 = arith.divf %94, %cst_25 : f32
    %cst_26 = arith.constant 0.000000e+00 : f32
    %96 = arith.subf %cst_26, %8 : f32
    %97 = vector.broadcast %96 : f32 to vector<8x1xf32>
    %98 = arith.subf %97, %80 : vector<8x1xf32>
    %99 = vector.shape_cast %98 : vector<8x1xf32> to vector<1x8x1xf32>
    %cst_27 = arith.constant dense<0.000000e+00> : vector<1xf32>
    %100 = vector.multi_reduction <add>, %99, %cst_27 [1, 2] : vector<1x8x1xf32> to vector<1xf32>
    %101 = vector.shape_cast %100 : vector<1xf32> to vector<1x1x1xf32>
    %102 = vector.extract %101[0, 0, 0] : f32 from vector<1x1x1xf32>
    %cst_28 = arith.constant 8.000000e+00 : f32
    %103 = arith.divf %102, %cst_28 : f32
    %104 = arith.cmpf one, %103, %103 : f32
    %cst_29 = arith.constant 0.000000e+00 : f32
    %105 = arith.select %104, %cst_29, %103 : f32
    %c24 = arith.constant 24 : index
    %c0_30 = arith.constant 0 : index
    %106 = vector.load %arg0[%c24, %c0_30] : memref<128x128xf32, #tpu.memory_space<vmem>>, vector<100x128xf32>
    %107 = arith.mulf %106, %106 : vector<100x128xf32>
    %cst_31 = arith.constant dense<0.000000e+00> : vector<100xf32>
    %108 = vector.multi_reduction <add>, %107, %cst_31 [1] : vector<100x128xf32> to vector<100xf32>
    %109 = vector.shape_cast %108 : vector<100xf32> to vector<100x1xf32>
    %cst_32 = arith.constant -5.000000e-01 : f32
    %110 = vector.broadcast %cst_32 : f32 to vector<100x1xf32>
    %111 = arith.mulf %110, %109 : vector<100x1xf32>
    %cst_33 = arith.constant 29.4060326 : f32
    %112 = vector.broadcast %cst_33 : f32 to vector<100x1xf32>
    %113 = arith.subf %111, %112 : vector<100x1xf32>
    %114 = vector.broadcast %3 : vector<1x128xf32> to vector<100x128xf32>
    %115 = arith.subf %106, %114 : vector<100x128xf32>
    %116 = vector.broadcast %15 : vector<1x128xf32> to vector<100x128xf32>
    %117 = arith.mulf %115, %116 : vector<100x128xf32>
    %118 = arith.mulf %117, %117 : vector<100x128xf32>
    %cst_34 = arith.constant dense<0.000000e+00> : vector<100xf32>
    %119 = vector.multi_reduction <add>, %118, %cst_34 [1] : vector<100x128xf32> to vector<100xf32>
    %120 = vector.shape_cast %119 : vector<100xf32> to vector<100x1xf32>
    %cst_35 = arith.constant -5.000000e-01 : f32
    %121 = vector.broadcast %cst_35 : f32 to vector<100x1xf32>
    %122 = arith.mulf %121, %120 : vector<100x1xf32>
    %123 = vector.broadcast %12 : f32 to vector<100x1xf32>
    %124 = arith.subf %122, %123 : vector<100x1xf32>
    %cst_36 = arith.constant 29.4060326 : f32
    %125 = vector.broadcast %cst_36 : f32 to vector<100x1xf32>
    %126 = arith.subf %124, %125 : vector<100x1xf32>
    %127 = vector.broadcast %2 : vector<1x128xf32> to vector<100x128xf32>
    %128 = arith.subf %106, %127 : vector<100x128xf32>
    %129 = vector.broadcast %19 : vector<1x128xf32> to vector<100x128xf32>
    %130 = arith.mulf %128, %129 : vector<100x128xf32>
    %131 = arith.mulf %130, %130 : vector<100x128xf32>
    %cst_37 = arith.constant dense<0.000000e+00> : vector<100xf32>
    %132 = vector.multi_reduction <add>, %131, %cst_37 [1] : vector<100x128xf32> to vector<100xf32>
    %133 = vector.shape_cast %132 : vector<100xf32> to vector<100x1xf32>
    %cst_38 = arith.constant -5.000000e-01 : f32
    %134 = vector.broadcast %cst_38 : f32 to vector<100x1xf32>
    %135 = arith.mulf %134, %133 : vector<100x1xf32>
    %cst_39 = arith.constant 29.4060326 : f32
    %136 = vector.broadcast %cst_39 : f32 to vector<100x1xf32>
    %137 = arith.subf %135, %136 : vector<100x1xf32>
    %138 = arith.subf %126, %113 : vector<100x1xf32>
    %cst_40 = arith.constant 0.000000e+00 : f32
    %139 = vector.broadcast %cst_40 : f32 to vector<100x1xf32>
    %140 = arith.subf %139, %137 : vector<100x1xf32>
    %141 = vector.broadcast %8 : f32 to vector<100x1xf32>
    %142 = arith.addf %140, %141 : vector<100x1xf32>
    %143 = tpu.iota {dimensions = array<i32: 0>} : vector<100x10xi32>
    %144 = tpu.iota {dimensions = array<i32: 1>} : vector<100x10xi32>
    %c10_i32 = arith.constant 10 : i32
    %145 = vector.broadcast %c10_i32 : i32 to vector<100x10xi32>
    %146 = arith.muli %144, %145 : vector<100x10xi32>
    %147 = arith.cmpi sge, %143, %146 : vector<100x10xi32>
    %c1_i32 = arith.constant 1 : i32
    %148 = vector.broadcast %c1_i32 : i32 to vector<100x10xi32>
    %149 = arith.addi %144, %148 : vector<100x10xi32>
    %c10_i32_41 = arith.constant 10 : i32
    %150 = vector.broadcast %c10_i32_41 : i32 to vector<100x10xi32>
    %151 = arith.muli %149, %150 : vector<100x10xi32>
    %152 = arith.cmpi slt, %143, %151 : vector<100x10xi32>
    %153 = arith.andi %147, %152 : vector<100x10xi1>
    %cst_42 = arith.constant 0xFF800000 : f32
    %154 = vector.shape_cast %138 : vector<100x1xf32> to vector<100x1xf32>
    %155 = vector.broadcast %154 : vector<100x1xf32> to vector<100x10xf32>
    %156 = vector.broadcast %cst_42 : f32 to vector<100x10xf32>
    %157 = arith.select %153, %155, %156 : vector<100x10xi1>, vector<100x10xf32>
    %cst_43 = arith.constant dense<0xFF800000> : vector<10xf32>
    %158 = vector.multi_reduction <maximumf>, %157, %cst_43 [0] : vector<100x10xf32> to vector<10xf32>
    %159 = vector.shape_cast %158 : vector<10xf32> to vector<1x10xf32>
    %160 = vector.broadcast %159 : vector<1x10xf32> to vector<100x10xf32>
    %161 = arith.subf %157, %160 : vector<100x10xf32>
    %162 = math.exp %161 : vector<100x10xf32>
    %cst_44 = arith.constant 0.000000e+00 : f32
    %163 = vector.broadcast %cst_44 : f32 to vector<100x10xf32>
    %164 = arith.select %153, %162, %163 : vector<100x10xi1>, vector<100x10xf32>
    %cst_45 = arith.constant dense<0.000000e+00> : vector<10xf32>
    %165 = vector.multi_reduction <add>, %164, %cst_45 [0] : vector<100x10xf32> to vector<10xf32>
    %166 = vector.shape_cast %165 : vector<10xf32> to vector<1x10xf32>
    %167 = vector.broadcast %166 : vector<1x10xf32> to vector<100x10xf32>
    %168 = arith.divf %164, %167 : vector<100x10xf32>
    %169 = arith.cmpf one, %168, %168 : vector<100x10xf32>
    %cst_46 = arith.constant 0.000000e+00 : f32
    %170 = vector.broadcast %cst_46 : f32 to vector<100x10xf32>
    %171 = arith.select %169, %170, %168 : vector<100x10xi1>, vector<100x10xf32>
    %cst_47 = arith.constant dense<0.000000e+00> : vector<10xf32>
    %172 = vector.multi_reduction <add>, %171, %cst_47 [0] : vector<100x10xf32> to vector<10xf32>
    %173 = vector.shape_cast %172 : vector<10xf32> to vector<1x10xf32>
    %cst_48 = arith.constant 0.000000e+00 : f32
    %174 = vector.broadcast %cst_48 : f32 to vector<1x10xf32>
    %175 = arith.cmpf oeq, %173, %174 : vector<1x10xf32>
    %cst_49 = arith.constant 1.000000e+00 : f32
    %cst_50 = arith.constant 0.000000e+00 : f32
    %176 = vector.broadcast %cst_49 : f32 to vector<100x10xf32>
    %177 = vector.broadcast %cst_50 : f32 to vector<100x10xf32>
    %178 = arith.select %153, %176, %177 : vector<100x10xi1>, vector<100x10xf32>
    %179 = vector.shape_cast %175 : vector<1x10xi1> to vector<1x10xi1>
    %180 = vector.broadcast %179 : vector<1x10xi1> to vector<100x10xi1>
    %181 = arith.select %180, %178, %171 : vector<100x10xi1>, vector<100x10xf32>
    %182 = vector.broadcast %142 : vector<100x1xf32> to vector<100x10xf32>
    %183 = arith.mulf %181, %182 : vector<100x10xf32>
    %184 = vector.shape_cast %183 : vector<100x10xf32> to vector<1x100x10xf32>
    %cst_51 = arith.constant dense<0.000000e+00> : vector<1xf32>
    %185 = vector.multi_reduction <add>, %184, %cst_51 [1, 2] : vector<1x100x10xf32> to vector<1xf32>
    %186 = vector.shape_cast %185 : vector<1xf32> to vector<1x1x1xf32>
    %187 = vector.extract %186[0, 0, 0] : f32 from vector<1x1x1xf32>
    %cst_52 = arith.constant 1.000000e+02 : f32
    %188 = arith.divf %187, %cst_52 : f32
    %cst_53 = arith.constant 9.900000e-01 : f32
    %189 = arith.mulf %cst_53, %53 : f32
    %cst_54 = arith.constant 0.00999999977 : f32
    %190 = arith.mulf %cst_54, %95 : f32
    %191 = arith.addf %189, %190 : f32
    %cst_55 = arith.constant 9.900000e-01 : f32
    %192 = arith.mulf %cst_55, %188 : f32
    %193 = arith.addf %191, %192 : f32
    %cst_56 = arith.constant 9.900000e-01 : f32
    %194 = arith.mulf %cst_56, %62 : f32
    %cst_57 = arith.constant 0.00999999977 : f32
    %195 = arith.mulf %cst_57, %105 : f32
    %196 = arith.addf %194, %195 : f32
    %cst_58 = arith.constant 9.900000e-01 : f32
    %197 = arith.mulf %cst_58, %188 : f32
    %198 = arith.addf %196, %197 : f32
    %199 = tpu.iota {dimensions = array<i32: 1>} : vector<1x128xi32>
    %c0_i32 = arith.constant 0 : i32
    %200 = vector.broadcast %c0_i32 : i32 to vector<1x128xi32>
    %201 = arith.cmpi eq, %199, %200 : vector<1x128xi32>
    %c1_i32_59 = arith.constant 1 : i32
    %202 = vector.broadcast %c1_i32_59 : i32 to vector<1x128xi32>
    %203 = arith.cmpi eq, %199, %202 : vector<1x128xi32>
    %cst_60 = arith.constant 0.000000e+00 : f32
    %204 = vector.broadcast %198 : f32 to vector<1x128xf32>
    %205 = vector.broadcast %cst_60 : f32 to vector<1x128xf32>
    %206 = arith.select %203, %204, %205 : vector<1x128xi1>, vector<1x128xf32>
    %207 = vector.broadcast %193 : f32 to vector<1x128xf32>
    %208 = arith.select %201, %207, %206 : vector<1x128xi1>, vector<1x128xf32>
    %c0_61 = arith.constant 0 : index
    %c0_62 = arith.constant 0 : index
    %209 = vector.load %arg1[%c0_61, %c0_62] : memref<1x128xf32, #tpu.memory_space<vmem>>, vector<1x128xf32>
    tpu.vector_store %arg1[%c0_61, %c0_62], %208 {strides = array<i32>} : memref<1x128xf32, #tpu.memory_space<vmem>>, vector<1x128xf32>,
    return
  }
}

</mosaic_0001>

<bundles_post_ra>
// kernel: mix_kl_loss.1
= control target key start
LH: loop header
LB: loop body
LE: loop exit
PB: predicated region body
PF: predicated region fallthrough
CT: control target
= control target key end

     0   :  { %vm9_vm0 = vcmask 1040384   ;;  %v39_v0 = vlaneseq  ;;  %vm206_vm1 = vcmask 1043456   ;;  %s1817_s0 = inlined_call_operand.vmem [shape: f32[128,128], index: 0, kind: input, shape index: {}]   ;;  %s1818_s1 = inlined_call_operand.vmem [shape: f32[1,128], index: 1, kind: output, shape index: {}]  }
   0x1   :  { %v933_v1 = vld [vmem:[%s1817_s0] sm:$0xff]  ;;  %v938_v2 = vld [vmem:[%s1817_s0 + $0x38] sm:$0xff]  ;;  %v962_v14 = vld [vmem:[%s1817_s0 + $0x8] sm:$0xff] }
   0x2   :  { %v10_v3 = vsel %vm9_vm0, %v933_v1, 0.0  ;;  %v33_v4 = vsub.f32 0.0, %v933_v1  ;;  %v943_v5 = vshrl.u32 %v39_v0, 7  ;;  %v21_v6 = vrot.slane %v933_v1, 3  ;;  %v951_v9 = vld [vmem:[%s1817_s0 + $0x18] sm:$0xff]  ;;  %v967_v15 = vld [vmem:[%s1817_s0 + $0x20] sm:$0xff] }
   0x3   :  { %11 = vadd.xlane.f32.xlu0 %v10_v3  ;;  %v173_v7 = vmul.f32 %v938_v2, %v938_v2  ;;  %v169_v12 = vmul.f32 %v951_v9, %v951_v9  ;;  %v972_v16 = vld [vmem:[%s1817_s0 + $0x30] sm:$0xff]  ;;  %v988_v23 = vld [vmem:[%s1817_s0 + $0x28] sm:$0xff]  ;;  %v36_v25 = vmul.f32 1.442695, %v933_v1  ;;  %v1012_v34 = vld [vmem:[%s1817_s0 + $0x40] sm:$0xff] }
   0x4   :  { %v34_v8 = vmul.f32 1.442695, %v33_v4  ;;  %v23_v10 = vsel %vm9_vm0, %v21_v6, 0.0  ;;  %v57_v11 = vsub.s32 2, %v943_v5  ;;  %v62_v17 = vsub.s32 3, %v943_v5  ;;  %v993_v24 = vld [vmem:[%s1817_s0 + $0x48] sm:$0xff] }
   0x5   :  { %190 = vadd.xlane.f32.xlu1 %v173_v7  ;;  %v1017_v35 = vld [vmem:[%s1817_s0 + $0x58] sm:$0xff]  ;;  %v1028_v44 = vld [vmem:[%s1817_s0 + $0x50] sm:$0xff]  ;;  %v41_v52 = vsub.s32 1, %v943_v5  ;;  %v46_v53 = vsub.s32 0, %v943_v5  ;;  %v171_v62 = vmul.f32 %v988_v23, %v988_v23  ;;  %v1054_v63 = vld [vmem:[%s1817_s0 + $0x60] sm:$0xff]  ;;  %v174_v6 = vmul.f32 %v1012_v34, %v1012_v34 }
   0x6   :  { %887 = vpow2.f32 %v34_v8  ;;  %v957_v13 = vrot.slane %v933_v1, %v57_v11  ;;  %v1043_v57 = vld [vmem:[%s1817_s0 + $0x10] sm:$0xff]  ;;  %v172_v11 = vmul.f32 %v972_v16, %v972_v16 }
   0x7   :  { %24 = vadd.xlane.f32.xlu0 %v23_v10  ;;  %889 = vpow2.f32 %v36_v25  ;;  %v1046_v59 = vrot.slane %v933_v1, %v41_v52  ;;  %v170_v1 = vmul.f32 %v967_v15, %v967_v15  ;;  %v1067_v8 = vld [vmem:[%s1817_s0 + $0x70] sm:$0xff] }
   0x8   :  { %v236_v18 = vsub.f32 %v951_v9, %v957_v13  ;;  %v59_v19 = vsub.f32 %v962_v14, %v957_v13  ;;  %v237_v20 = vsub.f32 %v967_v15, %v957_v13  ;;  %v240_v21 = vsub.f32 %v938_v2, %v957_v13 }
   0x9   :  { %v239_v22 = vsub.f32 %v972_v16, %v957_v13  ;;  %v238_v28 = vsub.f32 %v988_v23, %v957_v13  ;;  %v242_v29 = vsub.f32 %v993_v24, %v957_v13  ;;  %v241_v39 = vsub.f32 %v1012_v34, %v957_v13 }
   0xa   :  { %v244_v40 = vsub.f32 %v1017_v35, %v957_v13  ;;  %v243_v46 = vsub.f32 %v1028_v44, %v957_v13  ;;  %v245_v7 = vsub.f32 %v1054_v63, %v957_v13 }
   0xb   :  { %182 = vadd.xlane.f32.xlu0 %v169_v12  ;;  %v176_v12 = vmul.f32 %v1028_v44, %v1028_v44 }
  0x10   :  { %v996_v26 = vpop.eup %887 }
  0x11   :  { %v999_v27 = vrot.slane %v996_v26, %v62_v17  ;;  %v890_v50 = vpop.eup %889 }
  0x12   :  { %v108_v58 = vrot.slane %v890_v50, %v46_v53  ;;  %v347_v50 = vsub.f32 %v993_v24, %v1046_v59 }
  0x13   :  { %v249_v30 = vmul.f32 %v236_v18, %v999_v27  ;;  %v250_v31 = vmul.f32 %v237_v20, %v999_v27  ;;  %v253_v32 = vmul.f32 %v240_v21, %v999_v27  ;;  %v252_v33 = vmul.f32 %v239_v22, %v999_v27  ;;  %v1087_v20 = vld [vmem:[%s1817_s0 + $0x78] sm:$0xf] }
  0x14   :  { %v251_v38 = vmul.f32 %v238_v28, %v999_v27  ;;  %v255_v43 = vmul.f32 %v242_v29, %v999_v27  ;;  %v254_v45 = vmul.f32 %v241_v39, %v999_v27  ;;  %v257_v49 = vmul.f32 %v244_v40, %v999_v27 }
  0x15   :  { %v262_v36 = vmul.f32 %v249_v30, %v249_v30  ;;  %v263_v37 = vmul.f32 %v250_v31, %v250_v31  ;;  %v266_v41 = vmul.f32 %v253_v32, %v253_v32  ;;  %v265_v42 = vmul.f32 %v252_v33, %v252_v33 }
  0x16   :  { %v264_v47 = vmul.f32 %v251_v38, %v251_v38  ;;  %v268_v48 = vmul.f32 %v255_v43, %v255_v43  ;;  %v1035_v51 = vmul.f32 %v999_v27, %v59_v19  ;;  %v267_v54 = vmul.f32 %v254_v45, %v254_v45  ;;  %v1082_v19 = vld [vmem:[%s1817_s0 + $0x68] sm:$0xff] }
  0x17   :  { %275 = vadd.xlane.f32.xlu1 %v262_v36  ;;  %277 = vadd.xlane.f32.xlu0 %v263_v37  ;;  %v270_v55 = vmul.f32 %v257_v49, %v257_v49  ;;  %v256_v56 = vmul.f32 %v243_v46, %v999_v27  ;;  %v109_v60 = vmul.f32 %v108_v58, %v1043_v57 }
  0x18   :  { %v258_v17 = vmul.f32 %v245_v7, %v999_v27  ;;  %v247_v18 = vsub.f32 %v1067_v8, %v957_v13  ;;  %v175_v21 = vmul.f32 %v993_v24, %v993_v24  ;;  %v246_v28 = vsub.f32 %v1082_v19, %v957_v13 }
  0x19   :  { %v269_v61 = vmul.f32 %v256_v56, %v256_v56  ;;  %v110_v3 = vadd.f32 %v109_v60, %v1046_v59  ;;  %v248_v29 = vsub.f32 %v1087_v20, %v957_v13  ;;  %v177_v30 = vmul.f32 %v1017_v35, %v1017_v35 }
  0x1a   :  { %v271_v22 = vmul.f32 %v258_v17, %v258_v17  ;;  %v260_v25 = vmul.f32 %v247_v18, %v999_v27  ;;  %v259_v32 = vmul.f32 %v246_v28, %v999_v27  ;;  %v178_v36 = vmul.f32 %v1054_v63, %v1054_v63 }
  0x1b   :  { %283 = vadd.xlane.f32.xlu1 %v266_v41  ;;  %281 = vadd.xlane.f32.xlu0 %v265_v42  ;;  %v111_v4 = vsub.f32 %v110_v3, %v957_v13  ;;  %v261_v33 = vmul.f32 %v248_v29, %v999_v27  ;;  %v1103_v37 = vrot.slane %v996_v26, %v46_v53 }
  0x1c   :  { %v273_v31 = vmul.f32 %v260_v25, %v260_v25  ;;  %v272_v38 = vmul.f32 %v259_v32, %v259_v32  ;;  %v341_v13 = vsub.f32 %v951_v9, %v1046_v59  ;;  %v180_v40 = vmul.f32 %v1067_v8, %v1067_v8 }
  0x1d   :  { %v1070_v10 = vmul.f32 %v111_v4, %v999_v27  ;;  %v274_v39 = vmul.f32 %v261_v33, %v261_v33  ;;  %v343_v41 = vsub.f32 %v988_v23, %v1046_v59  ;;  %v179_v42 = vmul.f32 %v1082_v19, %v1082_v19 }
  0x1e   :  { %v354_v27 = vmul.f32 %v341_v13, %v1103_v37  ;;  %v342_v9 = vsub.f32 %v967_v15, %v1046_v59  ;;  %v345_v46 = vsub.f32 %v938_v2, %v1046_v59  ;;  %v346_v2 = vsub.f32 %v1012_v34, %v1046_v59 }
  0x1f   :  { %279 = vadd.xlane.f32.xlu1 %v264_v47  ;;  %287 = vadd.xlane.f32.xlu0 %v268_v48  ;;  %v299_v26 = vsel %vm206_vm1, %v274_v39, 0.0  ;;  %v356_v45 = vmul.f32 %v343_v41, %v1103_v37  ;;  %v181_v47 = vmul.f32 %v1087_v20, %v1087_v20  ;;  %v344_v48 = vsub.f32 %v972_v16, %v1046_v59 }
  0x20   :  { %v367_v43 = vmul.f32 %v354_v27, %v354_v27  ;;  %v355_v23 = vmul.f32 %v342_v9, %v1103_v37  ;;  %v358_v15 = vmul.f32 %v345_v46, %v1103_v37  ;;  %v360_v56 = vmul.f32 %v347_v50, %v1103_v37 }
  0x21   :  { %v369_v49 = vmul.f32 %v356_v45, %v356_v45  ;;  %v207_v52 = vsel %vm206_vm1, %v181_v47, 0.0  ;;  %v359_v58 = vmul.f32 %v346_v2, %v1103_v37  ;;  %v348_v24 = vsub.f32 %v1028_v44, %v1046_v59 }
  0x22   :  { %v368_v53 = vmul.f32 %v355_v23, %v355_v23  ;;  %v371_v16 = vmul.f32 %v358_v15, %v358_v15 }
  0x23   :  { %285 = vadd.xlane.f32.xlu1 %v267_v54  ;;  %291 = vadd.xlane.f32.xlu0 %v270_v55  ;;  %v349_v54 = vsub.f32 %v1017_v35, %v1046_v59  ;;  %v357_v55 = vmul.f32 %v344_v48, %v1103_v37  ;;  %v350_v35 = vsub.f32 %v1054_v63, %v1046_v59 }
  0x24   :  { %v372_v3 = vmul.f32 %v359_v58, %v359_v58  ;;  %v65_v63 = vmul.f32 %v1035_v51, %v1035_v51  ;;  %v352_v51 = vsub.f32 %v1067_v8, %v1046_v59 }
  0x25   :  { %v370_v60 = vmul.f32 %v357_v55, %v357_v55  ;;  %v362_v34 = vmul.f32 %v349_v54, %v1103_v37  ;;  %v363_v44 = vmul.f32 %v350_v35, %v1103_v37  ;;  %v1165_v54 = vand.u32 127, %v39_v0 }
  0x26   :  { %v365_v28 = vmul.f32 %v352_v51, %v1103_v37 }
  0x27   :  { %289 = vadd.xlane.f32.xlu1 %v269_v61  ;;  %186 = vadd.xlane.f32.xlu0 %v171_v62  ;;  %v373_v61 = vmul.f32 %v360_v56, %v360_v56  ;;  %v43_v62 = vsub.f32 %v962_v14, %v1046_v59  ;;  %v375_v4 = vmul.f32 %v362_v34, %v362_v34  ;;  %v502_v56 = vadd.s32 1, %v1165_v54 }
  0x28   :  { %v353_v14 = vsub.f32 %v1087_v20, %v1046_v59  ;;  %v113_v20 = vmul.f32 %v1070_v10, %v1070_v10  ;;  %v1179_v34 = vmul.u32 10, %v1165_v54 }
  0x29   :  { %v1181_v35 = vmul.u32 10, %v502_v56 }
  0x2a   :  { %vm489_vm2 = vcmp.ge.s32.totalorder %v943_v5, %v1179_v34 }
  0x2b   :  { %184 = vadd.xlane.f32.xlu1 %v170_v1  ;;  %192 = vadd.xlane.f32.xlu0 %v174_v6  ;;  %v361_v1 = vmul.f32 %v348_v24, %v1103_v37  ;;  %v351_v6 = vsub.f32 %v1082_v19, %v1046_v59  ;;  %vm504_vm4 = vcmp.lt.s32.totalorder %v943_v5, %v1181_v35 }
  0x2c   :  { %vm1325_vm0 = vmand %vm489_vm2, %vm504_vm4 }
  0x2d   :  { %v374_v7 = vmul.f32 %v361_v1, %v361_v1  ;;  %v364_v18 = vmul.f32 %v351_v6, %v1103_v37  ;;  %v1190_v1 = vadd.s32 40, %v943_v5  ;;  %v1196_v6 = vadd.s32 56, %v943_v5 }
  0x2f   :  { %188 = vadd.xlane.f32.xlu1 %v172_v11  ;;  %196 = vadd.xlane.f32.xlu0 %v176_v12  ;;  %v48_v11 = vmul.f32 %v1103_v37, %v43_v62  ;;  %v376_v12 = vmul.f32 %v363_v44, %v363_v44  ;;  %v377_v19 = vmul.f32 %v364_v18, %v364_v18  ;;  %v1193_v44 = vadd.s32 48, %v943_v5 }
  0x30   :  { %v1211_v18 = vadd.s32 96, %v943_v5  ;;  %vm509_vm13 = vcmp.lt.s32.totalorder %v1190_v1, %v1181_v35 }
  0x31   :  { %v50_v17 = vmul.f32 %v48_v11, %v48_v11 }
  0x33   :  { %194 = vadd.xlane.f32.xlu1 %v175_v21  ;;  %293 = vadd.xlane.f32.xlu0 %v271_v22  ;;  %v366_v21 = vmul.f32 %v353_v14, %v1103_v37  ;;  %v119_v22 = vmul.f32 %v1043_v57, %v1043_v57  ;;  %v1202_v14 = vadd.s32 72, %v943_v5 }
  0x35   :  { %v379_v25 = vmul.f32 %v366_v21, %v366_v21 }
  0x37   :  { %198 = vadd.xlane.f32.xlu1 %v177_v30  ;;  %297 = vadd.xlane.f32.xlu0 %v273_v31  ;;  %v404_v29 = vsel %vm206_vm1, %v379_v25, 0.0  ;;  %v378_v30 = vmul.f32 %v365_v28, %v365_v28 }
  0x3b   :  { %295 = vadd.xlane.f32.xlu1 %v272_v38  ;;  %200 = vadd.xlane.f32.xlu0 %v178_v36 }
  0x3f   :  { %300 = vadd.xlane.f32.xlu1 %v299_v26  ;;  %204 = vadd.xlane.f32.xlu0 %v180_v40 }
  0x43   :  { %202 = vadd.xlane.f32.xlu1 %v179_v42  ;;  %380 = vadd.xlane.f32.xlu0 %v367_v43 }
  0x47   :  { %208 = vadd.xlane.f32.xlu1 %v207_v52  ;;  %384 = vadd.xlane.f32.xlu0 %v369_v49 }
  0x4b   :  { %382 = vadd.xlane.f32.xlu1 %v368_v53  ;;  %388 = vadd.xlane.f32.xlu0 %v371_v16 }
  0x4f   :  { %386 = vadd.xlane.f32.xlu1 %v370_v60  ;;  %392 = vadd.xlane.f32.xlu0 %v373_v61  ;;  %v1173_v60 = vadd.s32 8, %v943_v5  ;;  %v1176_v61 = vadd.s32 16, %v943_v5 }
  0x51   :  { %vm490_vm3 = vcmp.ge.s32.totalorder %v1173_v60, %v1179_v34  ;;  %vm505_vm5 = vcmp.lt.s32.totalorder %v1173_v60, %v1181_v35  ;;  %vm491_vm6 = vcmp.ge.s32.totalorder %v1176_v61, %v1179_v34  ;;  %vm506_vm7 = vcmp.lt.s32.totalorder %v1176_v61, %v1181_v35 }
  0x52   :  { %vm1335_vm14 = vmand %vm490_vm3, %vm505_vm5 }
  0x53   :  { %390 = vadd.xlane.f32.xlu1 %v372_v3  ;;  %396 = vadd.xlane.f32.xlu0 %v375_v4  ;;  %v1184_v3 = vadd.s32 24, %v943_v5  ;;  %v1187_v4 = vadd.s32 32, %v943_v5  ;;  %vm1355_vm2 = vmand %vm491_vm6, %vm506_vm7  ;;  %vm1838_vm6 = vcmp.ge.s32.totalorder %v1190_v1, %v1179_v34 }
  0x54   :  { %vm1403_vm7 = vmand %vm1838_vm6, %vm509_vm13  ;;  %vm1845_vm13 = vcmp.lt.s32.totalorder %v1196_v6, %v1181_v35  ;;  %vm1846_vm6 = vcmp.ge.s32.totalorder %v1196_v6, %v1179_v34 }
  0x55   :  { %vm492_vm8 = vcmp.ge.s32.totalorder %v1184_v3, %v1179_v34  ;;  %vm507_vm9 = vcmp.lt.s32.totalorder %v1184_v3, %v1181_v35  ;;  %vm493_vm10 = vcmp.ge.s32.totalorder %v1187_v4, %v1179_v34  ;;  %vm508_vm11 = vcmp.lt.s32.totalorder %v1187_v4, %v1181_v35  ;;  %vm1430_vm5 = vmand %vm1846_vm6, %vm1845_vm13 }
  0x56   :  { %vm1369_vm3 = vmand %vm492_vm8, %vm507_vm9  ;;  %vm1841_vm9 = vcmp.lt.s32.totalorder %v1193_v44, %v1181_v35  ;;  %vm1853_vm13 = vcmp.lt.s32.totalorder %v1202_v14, %v1181_v35  ;;  %vm1854_vm6 = vcmp.ge.s32.totalorder %v1202_v14, %v1179_v34  ;;  %v1858_v14 = vmov 0 }
  0x57   :  { %394 = vadd.xlane.f32.xlu1 %v374_v7  ;;  %66 = vadd.xlane.f32.xlu0 %v65_v63  ;;  %v1199_v7 = vadd.s32 64, %v943_v5  ;;  %vm1390_vm4 = vmand %vm493_vm10, %vm508_vm11  ;;  %vm1842_vm10 = vcmp.ge.s32.totalorder %v1193_v44, %v1179_v34 }
  0x58   :  { %vm1420_vm11 = vmand %vm1842_vm10, %vm1841_vm9 }
  0x59   :  { %vm1849_vm9 = vcmp.lt.s32.totalorder %v1199_v7, %v1181_v35  ;;  %vm1850_vm10 = vcmp.ge.s32.totalorder %v1199_v7, %v1179_v34  ;;  %vm1452_vm8 = vmand %vm1854_vm6, %vm1853_vm13 }
  0x5a   :  { %vm1441_vm12 = vmand %vm1850_vm10, %vm1849_vm9 }
  0x5b   :  { %398 = vadd.xlane.f32.xlu1 %v376_v12  ;;  %51 = vadd.xlane.f32.xlu0 %v50_v17  ;;  %v1205_v12 = vadd.s32 80, %v943_v5  ;;  %v1208_v17 = vadd.s32 88, %v943_v5 }
  0x5d   :  { %vm514_vm1 = vcmp.lt.s32.totalorder %v1205_v12, %v1181_v35  ;;  %vm1857_vm9 = vcmp.ge.s32.totalorder %v1205_v12, %v1179_v34  ;;  %vm1860_vm13 = vcmp.lt.s32.totalorder %v1208_v17, %v1181_v35  ;;  %vm1861_vm6 = vcmp.ge.s32.totalorder %v1208_v17, %v1179_v34 }
  0x5e   :  { %vm1465_vm10 = vmand %vm1857_vm9, %vm514_vm1  ;;  %v1862_v12 = vmov 0  ;;  %vm1864_vm1 = vcmp.lt.s32.totalorder %v1211_v18, %v1181_v35  ;;  %vm1865_vm9 = vcmp.ge.s32.totalorder %v1211_v18, %v1179_v34 }
  0x5f   :  { %400 = vadd.xlane.f32.xlu1 %v377_v19  ;;  %120 = vadd.xlane.f32.xlu0 %v119_v22  ;;  %v1859_v14 = vsel %vm1465_vm10, 4294967295, %v1858_v14  ;;  %vm1479_vm15 = vmand %vm1861_vm6, %vm1860_vm13  ;;  %vm1869_vm6 = vcmask 80896  }
  0x60   :  { %v1863_v12 = vsel %vm1479_vm15, 4294967295, %v1862_v12  ;;  %vm1492_vm10 = vmand %vm1865_vm9, %vm1864_vm1  ;;  %vm1868_vm13 = vnez %v1859_v14 }
  0x61   :  { %vm1870_vm1 = vmmov %vm1869_vm6 }
  0x62   :  { %vm1871_vm9 = vmmov %vm1870_vm1 }
  0x63   :  { %114 = vadd.xlane.f32.xlu1 %v113_v20  ;;  %405 = vadd.xlane.f32.xlu0 %v404_v29 }
  0x67   :  { %402 = vadd.xlane.f32.xlu1 %v378_v30 }
  0x90   :  { %v12_v31 = vpop.xlane.xlu0 %11 }
  0x91   :  { %v13_v32 = vrot.slane %v12_v31, 4 }
  0x92   :  { %v191_v27 = vpop.xlane.xlu1 %190 }
  0x93   :  { %v14_v57 = vadd.f32 %v13_v32, %v12_v31  ;;  %v214_v0 = vmul.f32 -0.5, %v191_v27 }
  0x94   :  { %v25_v33 = vpop.xlane.xlu0 %24 }
  0x95   :  { %v15_v36 = vrot.slane %v14_v57, 2  ;;  %v26_v59 = vrot.slane %v25_v33, 4  ;;  %v1221_v21 = vadd.f32 -29.406033, %v214_v0 }
  0x97   :  { %v27_v8 = vadd.f32 %v26_v59, %v25_v33  ;;  %v16_v38 = vadd.f32 %v15_v36, %v14_v57 }
  0x98   :  { %v183_v41 = vpop.xlane.xlu0 %182 }
  0x99   :  { %v28_v13 = vrot.slane %v27_v8, 2  ;;  %v17_v39 = vrot.slane %v16_v38, 1  ;;  %v210_v62 = vmul.f32 -0.5, %v183_v41 }
  0x9b   :  { %v18_v40 = vadd.f32 %v17_v39, %v16_v38  ;;  %v29_v10 = vadd.f32 %v28_v13, %v27_v8  ;;  %v1223_v19 = vadd.f32 -29.406033, %v210_v62 }
  0x9d   :  { %872 = vpush %v18_v40  ;;  %v30_v37 = vrot.slane %v29_v10, 1 }
  0x9f   :  { %v31_v26 = vadd.f32 %v30_v37, %v29_v10 }
  0xa1   :  { %874 = vpush %v31_v26 }
  0xa4   :  { %v276_v42 = vpop.xlane.xlu1 %275  ;;  %v278_v9 = vpop.xlane.xlu0 %277 }
  0xa5   :  { %v1225_v22 = vmul.f32 -0.5, %v276_v42  ;;  %v1231_v25 = vmul.f32 -0.5, %v278_v9 }
  0xa8   :  { %v284_v43 = vpop.xlane.xlu1 %283  ;;  %v282_v45 = vpop.xlane.xlu0 %281 }
  0xa9   :  { %v1237_v30 = vmul.f32 -0.5, %v284_v43  ;;  %v1239_v31 = vmul.f32 -0.5, %v282_v45 }
  0xac   :  { %v280_v46 = vpop.xlane.xlu1 %279  ;;  %v288_v47 = vpop.xlane.xlu0 %287 }
  0xad   :  { %v1245_v59 = vmul.f32 -0.5, %v280_v46  ;;  %v1247_v8 = vmul.f32 -0.5, %v288_v47 }
  0xb0   :  { %v286_v23 = vpop.xlane.xlu1 %285  ;;  %v292_v48 = vpop.xlane.xlu0 %291 }
  0xb1   :  { %v1249_v38 = vmul.f32 -0.5, %v286_v23  ;;  %v1255_v39 = vmul.f32 -0.5, %v292_v48 }
  0xb4   :  { %v1162_v49 = vpop.xlane.xlu1 %289  ;;  %v187_v15 = vpop.xlane.xlu0 %186 }
  0xb5   :  { %v212_v51 = vmul.f32 -0.5, %v187_v15  ;;  %v1274_v42 = vmul.f32 -0.5, %v1162_v49 }
  0xb7   :  { %v1257_v40 = vadd.f32 -29.406033, %v212_v51 }
  0xb8   :  { %v185_v50 = vpop.xlane.xlu1 %184  ;;  %v193_v52 = vpop.xlane.xlu0 %192 }
  0xb9   :  { %v211_v20 = vmul.f32 -0.5, %v185_v50  ;;  %v215_v28 = vmul.f32 -0.5, %v193_v52 }
  0xbb   :  { %v1263_v27 = vadd.f32 -29.406033, %v211_v20  ;;  %v1265_v41 = vadd.f32 -29.406033, %v215_v28 }
  0xbc   :  { %v189_v53 = vpop.xlane.xlu1 %188  ;;  %v197_v2 = vpop.xlane.xlu0 %196 }
  0xbd   :  { %v213_v29 = vmul.f32 -0.5, %v189_v53  ;;  %v217_v32 = vmul.f32 -0.5, %v197_v2 }
  0xbf   :  { %v1267_v26 = vadd.f32 -29.406033, %v213_v29  ;;  %v1276_v9 = vadd.f32 -29.406033, %v217_v32 }
  0xc0   :  { %v195_v16 = vpop.xlane.xlu1 %194  ;;  %v1167_v55 = vpop.xlane.xlu0 %293 }
  0xc1   :  { %v216_v57 = vmul.f32 -0.5, %v195_v16  ;;  %v1281_v45 = vmul.f32 -0.5, %v1167_v55 }
  0xc3   :  { %v1278_v43 = vadd.f32 -29.406033, %v216_v57 }
  0xc4   :  { %v199_v58 = vpop.xlane.xlu1 %198  ;;  %v1170_v24 = vpop.xlane.xlu0 %297 }
  0xc5   :  { %v218_v13 = vmul.f32 -0.5, %v199_v58  ;;  %v1292_v48 = vmul.f32 -0.5, %v1170_v24 }
  0xc7   :  { %v1289_v23 = vadd.f32 -29.406033, %v218_v13 }
  0xc8   :  { %v296_v63 = vpop.xlane.xlu1 %295  ;;  %v201_v11 = vpop.xlane.xlu0 %200 }
  0xc9   :  { %v219_v10 = vmul.f32 -0.5, %v201_v11  ;;  %v312_v50 = vmul.f32 -0.5, %v296_v63 }
  0xcb   :  { %v1298_v52 = vadd.f32 -29.406033, %v219_v10 }
  0xcc   :  { %v301_v33 = vpop.xlane.xlu1 %300  ;;  %v205_v36 = vpop.xlane.xlu0 %204 }
  0xcd   :  { %v221_v37 = vmul.f32 -0.5, %v205_v36  ;;  %v314_v53 = vmul.f32 -0.5, %v301_v33 }
  0xce   :  { %s1283_s0 = spop %872 }
  0xcf   :  { %v1300_v2 = vadd.f32 -29.406033, %v221_v37  ;;  %v1307_v16 = vstv %s1283_s0  ;;  %s49_s10 = ssub.f32 0.0, %s1283_s0 }
  0xd0   :  { %v203_v46 = vpop.xlane.xlu1 %202  ;;  %v381_v47 = vpop.xlane.xlu0 %380 }
  0xd1   :  { %v220_v49 = vmul.f32 -0.5, %v203_v46  ;;  %v407_v15 = vmul.f32 -0.5, %v381_v47 }
  0xd2   :  { %s875_s9 = spop %874 }
  0xd3   :  { %v1309_v55 = vadd.f32 -29.406033, %v220_v49  ;;  %v859_v56 = vadd.f32 -29.406033, %v407_v15  ;;  %v1311_v58 = vstv %s875_s9 }
  0xd4   :  { %v209_v62 = vpop.xlane.xlu1 %208  ;;  %v315_v63 = vsub.f32 %v1225_v22, %v1311_v58  ;;  %v316_v5 = vsub.f32 %v1231_v25, %v1311_v58  ;;  %v317_v11 = vsub.f32 %v1245_v59, %v1311_v58  ;;  %v318_v51 = vsub.f32 %v1239_v31, %v1311_v58  ;;  %v1347_v20 = vpop.xlane.xlu0 %384 }
  0xd5   :  { %v446_v60 = vsub.f32 0.0, %v859_v56  ;;  %v222_v25 = vmul.f32 -0.5, %v209_v62  ;;  %v319_v28 = vsub.f32 %v1237_v30, %v1311_v58  ;;  %v320_v29 = vsub.f32 %v1249_v38, %v1311_v58 }
  0xd6   :  { %v321_v61 = vsub.f32 %v1247_v8, %v1311_v58  ;;  %v322_v32 = vsub.f32 %v1274_v42, %v1311_v58  ;;  %v323_v30 = vsub.f32 %v1255_v39, %v1311_v58  ;;  %v324_v57 = vsub.f32 %v1281_v45, %v1311_v58 }
  0xd7   :  { %v1382_v33 = vadd.f32 %v446_v60, %v1307_v16  ;;  %v845_v36 = vadd.f32 -29.406033, %v222_v25  ;;  %v325_v59 = vsub.f32 %v312_v50, %v1311_v58  ;;  %v326_v8 = vsub.f32 %v1292_v48, %v1311_v58 }
  0xd8   :  { %v327_v4 = vsub.f32 %v314_v53, %v1311_v58  ;;  %v846_v13 = vadd.f32 -29.406033, %v315_v63  ;;  %v847_v39 = vadd.f32 -29.406033, %v316_v5  ;;  %v848_v10 = vadd.f32 -29.406033, %v317_v11  ;;  %v1408_v37 = vpop.xlane.xlu1 %382  ;;  %v1410_v42 = vpop.xlane.xlu0 %388 }
  0xd9   :  { %v849_v45 = vadd.f32 -29.406033, %v318_v51  ;;  %v850_v46 = vadd.f32 -29.406033, %v319_v28  ;;  %v851_v47 = vadd.f32 -29.406033, %v320_v29 }
  0xda   :  { %v1847_v48 = vmov 0  ;;  %v852_v49 = vadd.f32 -29.406033, %v321_v61  ;;  %v853_v15 = vadd.f32 -29.406033, %v322_v32  ;;  %v433_v50 = vsub.f32 %v846_v13, %v1223_v19 }
  0xdb   :  { %v1848_v48 = vsel %vm1430_vm5, 4294967295, %v1847_v48  ;;  %v854_v44 = vadd.f32 -29.406033, %v323_v30  ;;  %v1851_v53 = vmov 0  ;;  %v855_v6 = vadd.f32 -29.406033, %v324_v57 }
  0xdc   :  { %v1852_v53 = vsel %vm1441_vm12, 4294967295, %v1851_v53  ;;  %v856_v56 = vadd.f32 -29.406033, %v325_v59  ;;  %v857_v62 = vadd.f32 -29.406033, %v326_v8  ;;  %v434_v63 = vsub.f32 %v847_v39, %v1263_v27  ;;  %v387_v60 = vpop.xlane.xlu1 %386 }
  0xdd   :  { %v1855_v19 = vmov 0  ;;  %v858_v7 = vadd.f32 -29.406033, %v327_v4  ;;  %v435_v5 = vsub.f32 %v848_v10, %v1257_v40  ;;  %v436_v11 = vsub.f32 %v849_v45, %v1267_v26 }
  0xde   :  { %v1856_v19 = vsel %vm1452_vm8, 4294967295, %v1855_v19  ;;  %v437_v51 = vsub.f32 %v850_v46, %v1221_v21  ;;  %v438_v27 = vsub.f32 %v851_v47, %v1265_v41  ;;  %v439_v25 = vsub.f32 %v852_v49, %v1278_v43  ;;  %v393_v21 = vpop.xlane.xlu0 %392 }
  0xdf   :  { %v440_v40 = vsub.f32 %v853_v15, %v1276_v9  ;;  %v441_v26 = vsub.f32 %v854_v44, %v1289_v23  ;;  %v442_v28 = vsub.f32 %v855_v6, %v1298_v52  ;;  %v443_v41 = vsub.f32 %v856_v56, %v1309_v55 }
  0xe0   :  { %v444_v43 = vsub.f32 %v857_v62, %v1300_v2  ;;  %v445_v9 = vsub.f32 %v858_v7, %v845_v36  ;;  %v1866_v23 = vmov 0  ;;  %v1498_v17 = vsel %vm1325_vm0, %v433_v50, -inf  ;;  %v391_v61 = vpop.xlane.xlu1 %390 }
  0xe1   :  { %v1867_v23 = vsel %vm1492_vm10, 4294967295, %v1866_v23  ;;  %v1502_v52 = vsel %vm1335_vm14, %v434_v63, -inf  ;;  %v1506_v2 = vsel %vm1355_vm2, %v435_v5, -inf  ;;  %v1510_v35 = vsel %vm1369_vm3, %v436_v11, -inf }
  0xe2   :  { %v1514_v34 = vsel %vm1390_vm4, %v437_v51, -inf  ;;  %v1518_v18 = vsel %vm1403_vm7, %v438_v27, -inf  ;;  %v1522_v55 = vsel %vm1420_vm11, %v439_v25, -inf  ;;  %v1526_v29 = vsel %vm1430_vm5, %v440_v40, -inf  ;;  %v397_v47 = vpop.xlane.xlu0 %396 }
  0xe3   :  { %v1530_v32 = vsel %vm1441_vm12, %v441_v26, -inf  ;;  %v1534_v30 = vsel %vm1452_vm8, %v442_v28, -inf  ;;  %v1538_v57 = vsel %vm1868_vm13, %v443_v41, -inf  ;;  %v1542_v36 = vsel %vm1479_vm15, %v444_v43, -inf  ;;  %vm1872_vm13 = vmmov %vm1870_vm1 }
  0xe4   :  { %v1546_v59 = vsel %vm1492_vm10, %v445_v9, -inf  ;;  %v544_v8 = vsel %vm1869_vm6, %v1498_v17, -inf  ;;  %v545_v4 = vsel %vm1870_vm1, %v1502_v52, -inf  ;;  %v546_v13 = vsel %vm1871_vm9, %v1506_v2, -inf  ;;  %vm1873_vm8 = vmmov %vm1870_vm1  ;;  %v395_v6 = vpop.xlane.xlu1 %394 }
  0xe5   :  { %v547_v39 = vsel %vm1872_vm13, %v1510_v35, -inf  ;;  %v548_v10 = vsel %vm1873_vm8, %v1514_v34, -inf  ;;  %vm1874_vm15 = vmmov %vm1870_vm1  ;;  %v409_v26 = vmul.f32 -0.5, %v1347_v20  ;;  %v408_v28 = vmul.f32 -0.5, %v1408_v37 }
  0xe6   :  { %v550_v45 = vsel %vm1874_vm15, %v1518_v18, -inf  ;;  %vm1875_vm10 = vmmov %vm1870_vm1  ;;  %v549_v49 = vmax.f32 %v544_v8, %v548_v10  ;;  %v411_v43 = vmul.f32 -0.5, %v1410_v42  ;;  %v410_v9 = vmul.f32 -0.5, %v387_v60 }
  0xe7   :  { %v552_v46 = vsel %vm1875_vm10, %v1522_v55, -inf  ;;  %v551_v15 = vmax.f32 %v545_v4, %v550_v45  ;;  %vm1876_vm6 = vmmov %vm1870_vm1  ;;  %v413_v8 = vmul.f32 -0.5, %v393_v21  ;;  %v412_v10 = vmul.f32 -0.5, %v391_v61  ;;  %v67_v45 = vpop.xlane.xlu0 %66 }
  0xe8   :  { %v553_v44 = vmax.f32 %v546_v13, %v552_v46  ;;  %v554_v50 = vsel %vm1876_vm6, %v1526_v29, -inf  ;;  %vm1877_vm13 = vmmov %vm1870_vm1  ;;  %v861_v13 = vadd.f32 -29.406033, %v409_v26  ;;  %vm75_vm9 = vcmask 7168  }
  0xe9   :  { %v555_v56 = vmax.f32 %v547_v39, %v554_v50  ;;  %v556_v62 = vsel %vm1877_vm13, %v1530_v32, -inf  ;;  %vm1878_vm8 = vmmov %vm1870_vm1  ;;  %v860_v39 = vadd.f32 -29.406033, %v408_v28  ;;  %v399_v50 = vpop.xlane.xlu1 %398  ;;  %v864_v20 = vadd.f32 -29.406033, %v412_v10 }
  0xea   :  { %v558_v63 = vsel %vm1878_vm8, %v1534_v30, -inf  ;;  %vm1879_vm15 = vmmov %vm1870_vm1  ;;  %v557_v5 = vmax.f32 %v549_v49, %v556_v62  ;;  %v863_v49 = vadd.f32 -29.406033, %v411_v43 }
  0xeb   :  { %v560_v7 = vsel %vm1879_vm15, %v1538_v57, -inf  ;;  %v559_v11 = vmax.f32 %v551_v15, %v558_v63  ;;  %vm1880_vm10 = vmmov %vm1870_vm1  ;;  %vm1881_vm1 = vcmask 76800   ;;  %v862_v15 = vadd.f32 -29.406033, %v410_v9  ;;  %v52_v26 = vpop.xlane.xlu0 %51 }
  0xec   :  { %v561_v51 = vmax.f32 %v553_v44, %v560_v7  ;;  %v562_v27 = vsel %vm1880_vm10, %v1542_v36, -inf  ;;  %v565_v40 = vsel %vm1881_vm1, %v1546_v59, -inf  ;;  %v865_v44 = vadd.f32 -29.406033, %v413_v8  ;;  %vm1882_vm13 = vmmov %vm1876_vm6 }
  0xed   :  { %v563_v25 = vmax.f32 %v555_v56, %v562_v27  ;;  %v566_v41 = vmax.f32 %v557_v5, %v565_v40  ;;  %v448_v56 = vsub.f32 0.0, %v861_v13  ;;  %v447_v62 = vsub.f32 0.0, %v860_v39  ;;  %vm1883_vm8 = vmmov %vm1876_vm6 }
  0xee   :  { %v450_v37 = vsub.f32 0.0, %v863_v49  ;;  %v449_v7 = vsub.f32 0.0, %v862_v15  ;;  %v452_v21 = vsub.f32 0.0, %v865_v44  ;;  %v451_v61 = vsub.f32 0.0, %v864_v20  ;;  %vm1884_vm15 = vmmov %vm1876_vm6 }
  0xef   :  { %v568_v4 = vmax.f32 %v561_v51, %v563_v25  ;;  %v567_v46 = vmax.f32 %v566_v41, %v559_v11  ;;  %v1578_v42 = vadd.f32 %v448_v56, %v1307_v16  ;;  %v1581_v60 = vadd.f32 %v447_v62, %v1307_v16  ;;  %v401_v41 = vpop.xlane.xlu1 %400  ;;  %v121_v56 = vpop.xlane.xlu0 %120  ;;  %vm1885_vm10 = vmmov %vm1876_vm6 }
  0xf0   :  { %v1584_v11 = vadd.f32 %v450_v37, %v1307_v16  ;;  %v1587_v51 = vadd.f32 %v449_v7, %v1307_v16  ;;  %v415_v27 = vmul.f32 -0.5, %v397_v47  ;;  %v1590_v25 = vadd.f32 %v452_v21, %v1307_v16  ;;  %vm1886_vm1 = vmmov %vm1876_vm6 }
  0xf1   :  { %v569_v63 = vmax.f32 %v567_v46, %v568_v4  ;;  %v1593_v40 = vadd.f32 %v451_v61, %v1307_v16  ;;  %v414_v8 = vmul.f32 -0.5, %v395_v6  ;;  %v68_v13 = vmul.f32 -0.5, %v67_v45 }
  0xf2   :  { %v867_v43 = vadd.f32 -29.406033, %v415_v27  ;;  %v416_v39 = vmul.f32 -0.5, %v399_v50  ;;  %v53_v49 = vmul.f32 -0.5, %v52_v26  ;;  %v417_v15 = vmul.f32 -0.5, %v401_v41 }
  0xf3   :  { %v570_v5 = vrot.slane %v569_v63, 4  ;;  %v866_v46 = vadd.f32 -29.406033, %v414_v8  ;;  %v70_v7 = vsub.f32 %v68_v13, %v1311_v58  ;;  %v122_v61 = vmul.f32 -0.5, %v121_v56 }
  0xf4   :  { %v454_v4 = vsub.f32 0.0, %v867_v43  ;;  %v868_v44 = vadd.f32 -29.406033, %v416_v39  ;;  %v869_v37 = vadd.f32 -29.406033, %v417_v15  ;;  %v73_v56 = vstv %s49_s10 }
  0xf5   :  { %v571_v28 = vmax.f32 %v569_v63, %v570_v5  ;;  %v453_v20 = vsub.f32 0.0, %v866_v46  ;;  %v115_v63 = vpop.xlane.xlu1 %114  ;;  %v829_v50 = vadd.f32 -29.406033, %v53_v49  ;;  %v830_v13 = vadd.f32 -29.406033, %v70_v7 }
  0xf6   :  { %v1596_v47 = vadd.f32 %v454_v4, %v1307_v16  ;;  %v455_v6 = vsub.f32 0.0, %v868_v44  ;;  %v456_v27 = vsub.f32 0.0, %v869_v37  ;;  %v116_v26 = vmul.f32 -0.5, %v115_v63 }
  0xf7   :  { %v572_v9 = vrot.slane %v571_v28, 2  ;;  %v1602_v45 = vadd.f32 %v453_v20, %v1307_v16  ;;  %v89_v39 = vsub.f32 0.0, %v829_v50 }
  0xf8   :  { %v1605_v5 = vadd.f32 %v455_v6, %v1307_v16  ;;  %v1624_v44 = vadd.f32 %v456_v27, %v1307_v16 }
  0xf9   :  { %v573_v10 = vmax.f32 %v571_v28, %v572_v9  ;;  %v90_v63 = vsub.f32 %v89_v39, %v73_v56 }
  0xfb   :  { %v574_v62 = vrot.slane %v573_v10, 1 }
  0xfd   :  { %v1599_v21 = vmax.f32 %v573_v10, %v574_v62  ;;  %v832_v10 = vadd.f32 -29.406033, %v122_v61  ;;  %v91_v61 = vsel %vm75_vm9, %v90_v63, 0.0 }
  0xfe   :  { %92 = vadd.xlane.f32.xlu0 %v91_v61 }
  0xff   :  { %v576_v28 = vsub.f32 %v1498_v17, %v1599_v21  ;;  %v577_v41 = vsub.f32 %v1502_v52, %v1599_v21  ;;  %v578_v43 = vsub.f32 %v1506_v2, %v1599_v21  ;;  %v579_v9 = vsub.f32 %v1510_v35, %v1599_v21 }
 0x100   :  { %v580_v8 = vsub.f32 %v1514_v34, %v1599_v21  ;;  %v581_v4 = vsub.f32 %v1518_v18, %v1599_v21  ;;  %v117_v52 = vsub.f32 %v116_v26, %v1311_v58  ;;  %v582_v2 = vsub.f32 %v1522_v55, %v1599_v21 }
 0x101   :  { %v589_v17 = vmul.f32 1.442695, %v576_v28  ;;  %v591_v46 = vmul.f32 1.442695, %v577_v41  ;;  %v593_v49 = vmul.f32 1.442695, %v578_v43  ;;  %v72_v35 = vsub.f32 %v830_v13, %v829_v50 }
 0x102   :  { %v595_v15 = vmul.f32 1.442695, %v579_v9  ;;  %v583_v34 = vsub.f32 %v1526_v29, %v1599_v21  ;;  %v597_v18 = vmul.f32 1.442695, %v580_v8  ;;  %v599_v62 = vmul.f32 1.442695, %v581_v4 }
 0x103   :  { %891 = vpow2.f32 %v589_v17  ;;  %v584_v58 = vsub.f32 %v1530_v32, %v1599_v21  ;;  %v125_v55 = vsub.f32 %v832_v10, %v1307_v16  ;;  %v831_v20 = vadd.f32 -29.406033, %v117_v52 }
 0x104   :  { %893 = vpow2.f32 %v591_v46  ;;  %v601_v37 = vmul.f32 1.442695, %v582_v2  ;;  %v74_v7 = vsub.f32 %v72_v35, %v73_v56  ;;  %v585_v29 = vsub.f32 %v1534_v30, %v1599_v21 }
 0x105   :  { %895 = vpow2.f32 %v593_v49  ;;  %v603_v6 = vmul.f32 1.442695, %v583_v34  ;;  %v140_v50 = vsub.f32 %v73_v56, %v831_v20  ;;  %v126_v32 = vsub.f32 %v125_v55, %v831_v20 }
 0x106   :  { %897 = vpow2.f32 %v595_v15  ;;  %v76_v27 = vsel %vm75_vm9, %v74_v7, 0.0  ;;  %v586_v26 = vsub.f32 %v1538_v57, %v1599_v21  ;;  %v605_v28 = vmul.f32 1.442695, %v584_v58 }
 0x107   :  { %899 = vpow2.f32 %v597_v18  ;;  %77 = vadd.xlane.f32.xlu1 %v76_v27  ;;  %v141_v41 = vsel %vm75_vm9, %v140_v50, 0.0  ;;  %v127_v30 = vsel %vm75_vm9, %v126_v32, 0.0  ;;  %v587_v43 = vsub.f32 %v1542_v36, %v1599_v21  ;;  %vm1887_vm9 = vmmov %vm1886_vm1 }
 0x108   :  { %901 = vpow2.f32 %v599_v62  ;;  %v607_v9 = vmul.f32 1.442695, %v585_v29  ;;  %142 = vadd.xlane.f32.xlu0 %v141_v41  ;;  %v588_v57 = vsub.f32 %v1546_v59, %v1599_v21  ;;  %v609_v13 = vmul.f32 1.442695, %v586_v26 }
 0x109   :  { %903 = vpow2.f32 %v601_v37  ;;  %v611_v49 = vmul.f32 1.442695, %v587_v43 }
 0x10a   :  { %905 = vpow2.f32 %v603_v6  ;;  %v613_v34 = vmul.f32 1.442695, %v588_v57 }
 0x10b   :  { %128 = vadd.xlane.f32.xlu1 %v127_v30  ;;  %907 = vpow2.f32 %v605_v28 }
 0x10c   :  { %909 = vpow2.f32 %v607_v9 }
 0x10d   :  { %v892_v8 = vpop.eup %891  ;;  %911 = vpow2.f32 %v609_v13 }
 0x10e   :  { %v894_v4 = vpop.eup %893  ;;  %v1645_v39 = vsel %vm1325_vm0, %v892_v8, 0.0  ;;  %913 = vpow2.f32 %v611_v49 }
 0x10f   :  { %v896_v10 = vpop.eup %895  ;;  %v616_v17 = vsel %vm1335_vm14, %v894_v4, 0.0  ;;  %v628_v36 = vsel %vm1876_vm6, %v1645_v39, 0.0  ;;  %915 = vpow2.f32 %v613_v34  ;;  %vm1888_vm6 = vmmov %vm1886_vm1 }
 0x110   :  { %v898_v46 = vpop.eup %897  ;;  %v617_v52 = vsel %vm1355_vm2, %v896_v10, 0.0  ;;  %v629_v59 = vsel %vm1882_vm13, %v616_v17, 0.0  ;;  %vm1889_vm13 = vnez %v1856_v19 }
 0x111   :  { %v900_v21 = vpop.eup %899  ;;  %v618_v2 = vsel %vm1369_vm3, %v898_v46, 0.0  ;;  %v630_v15 = vadd.f32 %v629_v59, %v628_v36  ;;  %v631_v18 = vsel %vm1883_vm8, %v617_v52, 0.0  ;;  %vm1890_vm8 = vmmov %vm1886_vm1 }
 0x112   :  { %v902_v35 = vpop.eup %901  ;;  %v619_v56 = vsel %vm1390_vm4, %v900_v21, 0.0  ;;  %v633_v55 = vsel %vm1884_vm15, %v618_v2, 0.0  ;;  %vm1891_vm15 = vnez %v1859_v14 }
 0x113   :  { %v632_v62 = vadd.f32 %v631_v18, %v630_v15  ;;  %v904_v58 = vpop.eup %903  ;;  %v620_v20 = vsel %vm1403_vm7, %v902_v35, 0.0  ;;  %v635_v7 = vsel %vm1885_vm10, %v619_v56, 0.0  ;;  %vm1892_vm10 = vmmov %vm1886_vm1 }
 0x114   :  { %v906_v63 = vpop.eup %905  ;;  %v621_v29 = vsel %vm1420_vm11, %v904_v58, 0.0  ;;  %v637_v61 = vsel %vm1886_vm1, %v620_v20, 0.0  ;;  %vm1893_vm1 = vnez %v1863_v12 }
 0x115   :  { %v634_v37 = vadd.f32 %v633_v55, %v632_v62  ;;  %v908_v50 = vpop.eup %907  ;;  %v622_v27 = vsel %vm1430_vm5, %v906_v63, 0.0  ;;  %v639_v28 = vsel %vm1887_vm9, %v621_v29, 0.0  ;;  %vm1894_vm9 = vmmov %vm1888_vm6 }
 0x116   :  { %v910_v26 = vpop.eup %909  ;;  %v623_v41 = vsel %vm1441_vm12, %v908_v50, 0.0  ;;  %v641_v9 = vsel %vm1888_vm6, %v622_v27, 0.0  ;;  %vm1895_vm6 = vnez %v1867_v23 }
 0x117   :  { %v636_v6 = vadd.f32 %v635_v7, %v634_v37  ;;  %v912_v43 = vpop.eup %911  ;;  %v624_v8 = vsel %vm1889_vm13, %v910_v26, 0.0  ;;  %v643_v13 = vsel %vm1890_vm8, %v623_v41, 0.0  ;;  %vm1896_vm13 = vmmov %vm1890_vm8  ;;  %vm1897_vm8 = vcmask 76800  }
 0x118   :  { %v914_v57 = vpop.eup %913  ;;  %v625_v10 = vsel %vm1891_vm15, %v912_v43, 0.0  ;;  %v645_v49 = vsel %vm1892_vm10, %v624_v8, 0.0 }
 0x119   :  { %v638_v32 = vadd.f32 %v637_v61, %v636_v6  ;;  %v916_v46 = vpop.eup %915  ;;  %v626_v59 = vsel %vm1893_vm1, %v914_v57, 0.0  ;;  %v647_v15 = vsel %vm1894_vm9, %v625_v10, 0.0  ;;  %vm1898_vm1 = vcmask 80896  }
 0x11a   :  { %v627_v35 = vsel %vm1895_vm6, %v916_v46, 0.0  ;;  %v649_v18 = vsel %vm1896_vm13, %v626_v59, 0.0  ;;  %vm1899_vm15 = vmmov %vm1898_vm1 }
 0x11b   :  { %v640_v30 = vadd.f32 %v639_v28, %v638_v32  ;;  %v651_v58 = vsel %vm1897_vm8, %v627_v35, 0.0  ;;  %vm1901_vm5 = vmmov %vm1898_vm1 }
 0x11d   :  { %v642_v4 = vadd.f32 %v641_v9, %v640_v30 }
 0x11f   :  { %v644_v36 = vadd.f32 %v643_v13, %v642_v4 }
 0x121   :  { %v646_v21 = vadd.f32 %v645_v49, %v644_v36 }
 0x123   :  { %v648_v34 = vadd.f32 %v647_v15, %v646_v21 }
 0x125   :  { %v650_v62 = vadd.f32 %v649_v18, %v648_v34 }
 0x127   :  { %v652_v55 = vadd.f32 %v651_v58, %v650_v62 }
 0x129   :  { %v653_v37 = vrot.slane %v652_v55, 4 }
 0x12b   :  { %v654_v63 = vadd.f32 %v653_v37, %v652_v55 }
 0x12d   :  { %v655_v7 = vrot.slane %v654_v63, 2 }
 0x12f   :  { %v656_v6 = vadd.f32 %v655_v7, %v654_v63 }
 0x131   :  { %v657_v50 = vrot.slane %v656_v6, 1 }
 0x133   :  { %v658_v61 = vadd.f32 %v657_v50, %v656_v6 }
 0x135   :  { %917 = vrcp.f32 %v658_v61 }
 0x13f   :  { %v918_v32 = vpop.eup %917 }
 0x140   :  { %v660_v26 = vmul.f32 %v918_v32, %v1645_v39  ;;  %v661_v28 = vmul.f32 %v918_v32, %v616_v17  ;;  %v662_v30 = vmul.f32 %v918_v32, %v617_v52  ;;  %v663_v43 = vmul.f32 %v918_v32, %v618_v2 }
 0x141   :  { %v664_v9 = vmul.f32 %v918_v32, %v619_v56  ;;  %v665_v13 = vmul.f32 %v918_v32, %v620_v20  ;;  %v666_v46 = vmul.f32 %v918_v32, %v621_v29  ;;  %v667_v56 = vmul.f32 %v918_v32, %v622_v27 }
 0x142   :  { %vm673_vm10 = vcmp.ne.f32.partialorder %v660_v26, %v660_v26  ;;  %vm674_vm9 = vcmp.ne.f32.partialorder %v661_v28, %v661_v28  ;;  %vm675_vm13 = vcmp.ne.f32.partialorder %v662_v30, %v662_v30  ;;  %vm676_vm8 = vcmp.ne.f32.partialorder %v663_v43, %v663_v43 }
 0x143   :  { %v1686_v4 = vsel %vm673_vm10, 0.0, %v660_v26  ;;  %v1688_v57 = vsel %vm674_vm9, 0.0, %v661_v28  ;;  %v1690_v36 = vsel %vm675_vm13, 0.0, %v662_v30  ;;  %vm677_vm6 = vcmp.ne.f32.partialorder %v664_v9, %v664_v9  ;;  %vm1900_vm9 = vmmov %vm1898_vm1 }
 0x144   :  { %v699_v39 = vsel %vm1898_vm1, %v1686_v4, 0.0  ;;  %v700_v17 = vsel %vm1899_vm15, %v1688_v57, 0.0  ;;  %v1696_v52 = vsel %vm676_vm8, 0.0, %v663_v43  ;;  %vm678_vm10 = vcmp.ne.f32.partialorder %v665_v13, %v665_v13  ;;  %vm1902_vm8 = vmmov %vm1898_vm1 }
 0x145   :  { %v701_v2 = vadd.f32 %v700_v17, %v699_v39  ;;  %v702_v49 = vsel %vm1900_vm9, %v1690_v36, 0.0  ;;  %v1700_v20 = vsel %vm677_vm6, 0.0, %v664_v9  ;;  %v668_v15 = vmul.f32 %v918_v32, %v623_v41  ;;  %vm1905_vm12 = vmmov %vm1902_vm8 }
 0x146   :  { %vm679_vm13 = vcmp.ne.f32.partialorder %v666_v46, %v666_v46  ;;  %v704_v29 = vsel %vm1901_vm5, %v1696_v52, 0.0  ;;  %v1704_v34 = vsel %vm678_vm10, 0.0, %v665_v13  ;;  %v669_v62 = vmul.f32 %v918_v32, %v624_v8  ;;  %vm1903_vm10 = vmmov %vm1898_vm1 }
 0x147   :  { %v703_v21 = vadd.f32 %v702_v49, %v701_v2  ;;  %vm680_vm15 = vcmp.ne.f32.partialorder %v667_v56, %v667_v56  ;;  %v706_v27 = vsel %vm1898_vm1, %v1700_v20, 0.0  ;;  %v1708_v58 = vsel %vm679_vm13, 0.0, %v666_v46  ;;  %vm1904_vm13 = vmmov %vm1898_vm1 }
 0x148   :  { %v670_v37 = vmul.f32 %v918_v32, %v625_v10  ;;  %vm681_vm6 = vcmp.ne.f32.partialorder %v668_v15, %v668_v15  ;;  %v708_v41 = vsel %vm1902_vm8, %v1704_v34, 0.0  ;;  %v1712_v63 = vsel %vm680_vm15, 0.0, %v667_v56 }
 0x149   :  { %v705_v18 = vadd.f32 %v704_v29, %v703_v21  ;;  %v671_v6 = vmul.f32 %v918_v32, %v626_v59  ;;  %vm682_vm5 = vcmp.ne.f32.partialorder %v669_v62, %v669_v62  ;;  %v710_v8 = vsel %vm1903_vm10, %v1708_v58, 0.0  ;;  %v406_v29 = vpop.xlane.xlu0 %405 }
 0x14a   :  { %v694_v50 = vsel %vm681_vm6, 0.0, %v668_v15  ;;  %v672_v26 = vmul.f32 %v918_v32, %v627_v35  ;;  %vm683_vm9 = vcmp.ne.f32.partialorder %v670_v37, %v670_v37  ;;  %v712_v28 = vsel %vm1904_vm13, %v1712_v63, 0.0  ;;  %vm1906_vm6 = vmmov %vm1902_vm8 }
 0x14b   :  { %v707_v55 = vadd.f32 %v706_v27, %v705_v18  ;;  %v1718_v10 = vsel %vm682_vm5, 0.0, %v669_v62  ;;  %vm684_vm1 = vcmp.ne.f32.partialorder %v671_v6, %v671_v6  ;;  %v714_v43 = vsel %vm1902_vm8, %v694_v50, 0.0  ;;  %vm1907_vm5 = vmmov %vm1906_vm6  ;;  %v403_v18 = vpop.xlane.xlu1 %402 }
 0x14c   :  { %v1721_v9 = vsel %vm683_vm9, 0.0, %v670_v37  ;;  %vm685_vm15 = vcmp.ne.f32.partialorder %v672_v26, %v672_v26  ;;  %v716_v13 = vsel %vm1905_vm12, %v1718_v10, 0.0  ;;  %v1725_v46 = vsel %vm684_vm1, 0.0, %v671_v6  ;;  %vm1916_vm9 = vmmov %vm1907_vm5 }
 0x14d   :  { %v709_v7 = vadd.f32 %v708_v41, %v707_v55  ;;  %v718_v32 = vsel %vm1906_vm6, %v1721_v9, 0.0  ;;  %v1729_v39 = vsel %vm685_vm15, 0.0, %v672_v26  ;;  %v720_v2 = vsel %vm1907_vm5, %v1725_v46, 0.0  ;;  %vm1918_vm1 = vmmov %vm1907_vm5 }
 0x14e   :  { %vm1908_vm10 = vcmask 76800   ;;  %v419_v55 = vmul.f32 -0.5, %v406_v29  ;;  %v418_v37 = vmul.f32 -0.5, %v403_v18  ;;  %vm1909_vm12 = vnez %v1852_v53  ;;  %vm1919_vm8 = vmmov %vm1918_vm1 }
 0x14f   :  { %v711_v61 = vadd.f32 %v710_v8, %v709_v7  ;;  %v722_v49 = vsel %vm1908_vm10, %v1729_v39, 0.0  ;;  %vm1917_vm13 = vnez %v1867_v23  ;;  %vm1920_vm15 = vmmov %vm1918_vm1 }
 0x150   :  { %v871_v6 = vadd.f32 -29.406033, %v419_v55  ;;  %v870_v8 = vadd.f32 -29.406033, %v418_v37  ;;  %vm1921_vm6 = vmmov %vm1918_vm1 }
 0x151   :  { %v713_v30 = vadd.f32 %v712_v28, %v711_v61  ;;  %v919_v61 = vmov 0.0   ;;  %vm1923_vm10 = vmmov %vm1918_vm1 }
 0x152   :  { %v733_v26 = vsel %vm1355_vm2, 1.0, %v919_v61  ;;  %v731_v28 = vsel %vm1325_vm0, 1.0, %v919_v61  ;;  %v736_v22 = vsel %vm1403_vm7, 1.0, %v919_v61  ;;  %v739_v24 = vsel %vm1909_vm12, 1.0, %v919_v61  ;;  %vm1914_vm7 = vmmov %vm1907_vm5 }
 0x153   :  { %v715_v59 = vadd.f32 %v714_v43, %v713_v30  ;;  %v732_v30 = vsel %vm1335_vm14, 1.0, %v919_v61  ;;  %v735_v43 = vsel %vm1390_vm4, 1.0, %v919_v61  ;;  %vm1910_vm0 = vnez %v1848_v48  ;;  %vm1924_vm12 = vmmov %vm1918_vm1 }
 0x154   :  { %v738_v0 = vsel %vm1910_vm0, 1.0, %v919_v61  ;;  %vm1911_vm14 = vnez %v1856_v19  ;;  %vm1912_vm2 = vnez %v1859_v14  ;;  %v458_v31 = vsub.f32 0.0, %v871_v6  ;;  %vm1925_vm0 = vmmov %vm1918_vm1 }
 0x155   :  { %v717_v35 = vadd.f32 %v716_v13, %v715_v59  ;;  %v734_v13 = vsel %vm1369_vm3, 1.0, %v919_v61  ;;  %v740_v3 = vsel %vm1911_vm14, 1.0, %v919_v61  ;;  %vm1913_vm3 = vnez %v1863_v12  ;;  %vm1926_vm14 = vmmov %vm1925_vm0 }
 0x156   :  { %v742_v1 = vsel %vm1913_vm3, 1.0, %v919_v61  ;;  %v471_v18 = vadd.f32 %v458_v31, %v1307_v16  ;;  %vm818_vm3 = vcmp.eq.s32.totalorder %v1165_v54, 0 }
 0x157   :  { %v719_v17 = vadd.f32 %v718_v32, %v717_v35  ;;  %v737_v35 = vsel %vm1420_vm11, 1.0, %v919_v61  ;;  %v741_v32 = vsel %vm1912_vm2, 1.0, %v919_v61  ;;  %vm1915_vm11 = vmmov %vm1907_vm5  ;;  %vm1927_vm2 = vcmask 76800  }
 0x158   :  { %vm1922_vm5 = vmmov %vm1918_vm1 }
 0x159   :  { %v721_v56 = vadd.f32 %v720_v2, %v719_v17  ;;  %v457_v17 = vsub.f32 0.0, %v870_v8 }
 0x15b   :  { %v723_v21 = vadd.f32 %v722_v49, %v721_v56 }
 0x15d   :  { %v724_v15 = vrot.slane %v723_v21, 4 }
 0x15f   :  { %v725_v62 = vadd.f32 %v724_v15, %v723_v21 }
 0x161   :  { %v726_v27 = vrot.slane %v725_v62, 2 }
 0x163   :  { %v727_v41 = vadd.f32 %v726_v27, %v725_v62 }
 0x165   :  { %v728_v7 = vrot.slane %v727_v41, 1 }
 0x167   :  { %v729_v59 = vadd.f32 %v728_v7, %v727_v41 }
 0x169   :  { %vm730_vm4 = vcmp.eq.f32.partialorder %v729_v59, 0.0 }
 0x16a   :  { %v748_v38 = vsel %vm730_vm4, %v733_v26, %v1690_v36  ;;  %v746_v53 = vsel %vm730_vm4, %v731_v28, %v1686_v4  ;;  %v747_v48 = vsel %vm730_vm4, %v732_v30, %v1688_v57  ;;  %v750_v19 = vsel %vm730_vm4, %v735_v43, %v1700_v20 }
 0x16b   :  { %v761_v14 = vmul.f32 %v748_v38, %v1578_v42  ;;  %v759_v2 = vmul.f32 %v746_v53, %v1382_v33  ;;  %v760_v12 = vmul.f32 %v747_v48, %v1581_v60  ;;  %v763_v56 = vmul.f32 %v750_v19, %v1584_v11 }
 0x16c   :  { %v749_v36 = vsel %vm730_vm4, %v734_v13, %v1696_v52  ;;  %v752_v4 = vsel %vm730_vm4, %v737_v35, %v1708_v58  ;;  %v751_v57 = vsel %vm730_vm4, %v736_v22, %v1704_v34  ;;  %v754_v49 = vsel %vm730_vm4, %v739_v24, %v694_v50 }
 0x16d   :  { %v775_v20 = vsel %vm1914_vm7, %v761_v14, 0.0  ;;  %v772_v42 = vsel %vm1915_vm11, %v759_v2, 0.0  ;;  %v773_v33 = vsel %vm1916_vm9, %v760_v12, 0.0  ;;  %v743_v60 = vsel %vm1917_vm13, 1.0, %v919_v61 }
 0x16e   :  { %v774_v11 = vadd.f32 %v773_v33, %v772_v42  ;;  %v762_v52 = vmul.f32 %v749_v36, %v1587_v51  ;;  %v765_v21 = vmul.f32 %v752_v4, %v1590_v25  ;;  %v764_v58 = vmul.f32 %v751_v57, %v1593_v40 }
 0x16f   :  { %v767_v34 = vmul.f32 %v754_v49, %v1596_v47  ;;  %v753_v50 = vsel %vm730_vm4, %v738_v0, %v1712_v63  ;;  %v755_v15 = vsel %vm730_vm4, %v740_v3, %v1718_v10  ;;  %v756_v29 = vsel %vm730_vm4, %v741_v32, %v1721_v9 }
 0x170   :  { %v776_v23 = vadd.f32 %v775_v20, %v774_v11  ;;  %v470_v51 = vadd.f32 %v457_v17, %v1307_v16  ;;  %v777_v25 = vsel %vm1918_vm1, %v762_v52, 0.0  ;;  %v766_v40 = vmul.f32 %v753_v50, %v1602_v45 }
 0x171   :  { %v768_v47 = vmul.f32 %v755_v15, %v1605_v5  ;;  %v769_v62 = vmul.f32 %v756_v29, %v1624_v44  ;;  %v757_v10 = vsel %vm730_vm4, %v742_v1, %v1725_v46  ;;  %v758_v9 = vsel %vm730_vm4, %v743_v60, %v1729_v39 }
 0x172   :  { %v778_v63 = vadd.f32 %v777_v25, %v776_v23  ;;  %v779_v27 = vsel %vm1919_vm8, %v763_v56, 0.0  ;;  %v770_v55 = vmul.f32 %v757_v10, %v470_v51  ;;  %v771_v37 = vmul.f32 %v758_v9, %v471_v18 }
 0x173   :  { %v781_v41 = vsel %vm1920_vm15, %v764_v58, 0.0  ;;  %v783_v45 = vsel %vm1921_vm6, %v765_v21, 0.0  ;;  %v785_v44 = vsel %vm1922_vm5, %v766_v40, 0.0  ;;  %v787_v8 = vsel %vm1923_vm10, %v767_v34, 0.0 }
 0x174   :  { %v780_v16 = vadd.f32 %v779_v27, %v778_v63  ;;  %v789_v61 = vsel %vm1924_vm12, %v768_v47, 0.0  ;;  %v791_v26 = vsel %vm1925_vm0, %v769_v62, 0.0  ;;  %v793_v30 = vsel %vm1926_vm14, %v770_v55, 0.0 }
 0x175   :  { %v795_v59 = vsel %vm1927_vm2, %v771_v37, 0.0  ;;  %vm819_vm4 = vcmp.eq.s32.totalorder %v1165_v54, 1 }
 0x176   :  { %v782_v7 = vadd.f32 %v781_v41, %v780_v16 }
 0x178   :  { %v784_v5 = vadd.f32 %v783_v45, %v782_v7 }
 0x17a   :  { %v786_v6 = vadd.f32 %v785_v44, %v784_v5 }
 0x17c   :  { %v788_v46 = vadd.f32 %v787_v8, %v786_v6 }
 0x17e   :  { %v790_v39 = vadd.f32 %v789_v61, %v788_v46 }
 0x180   :  { %v792_v28 = vadd.f32 %v791_v26, %v790_v39 }
 0x182   :  { %v794_v43 = vadd.f32 %v793_v30, %v792_v28 }
 0x184   :  { %v796_v13 = vadd.f32 %v795_v59, %v794_v43 }
 0x186   :  { %797 = vadd.xlane.f32.xlu1 %v796_v13 }
 0x18b   :  { %v93_v22 = vpop.xlane.xlu0 %92 }
 0x18c   :  { %v94_v0 = vrot.slane %v93_v22, 4 }
 0x18e   :  { %v95_v32 = vadd.f32 %v94_v0, %v93_v22 }
 0x190   :  { %v96_v38 = vrot.slane %v95_v32, 2 }
 0x192   :  { %v97_v12 = vadd.f32 %v96_v38, %v95_v32 }
 0x194   :  { %v78_v35 = vpop.xlane.xlu1 %77  ;;  %v98_v57 = vrot.slane %v97_v12, 1 }
 0x195   :  { %v79_v24 = vrot.slane %v78_v35, 4  ;;  %v143_v1 = vpop.xlane.xlu0 %142 }
 0x196   :  { %v144_v48 = vrot.slane %v143_v1, 4  ;;  %v99_v42 = vadd.f32 %v98_v57, %v97_v12 }
 0x197   :  { %v80_v3 = vadd.f32 %v79_v24, %v78_v35 }
 0x198   :  { %v129_v31 = vpop.xlane.xlu1 %128  ;;  %v145_v14 = vadd.f32 %v144_v48, %v143_v1 }
 0x199   :  { %v81_v17 = vrot.slane %v80_v3, 2  ;;  %v130_v53 = vrot.slane %v129_v31, 4 }
 0x19a   :  { %v146_v36 = vrot.slane %v145_v14, 2 }
 0x19b   :  { %v131_v19 = vadd.f32 %v130_v53, %v129_v31  ;;  %v82_v2 = vadd.f32 %v81_v17, %v80_v3 }
 0x19c   :  { %v147_v49 = vadd.f32 %v146_v36, %v145_v14 }
 0x19d   :  { %v132_v56 = vrot.slane %v131_v19, 2  ;;  %v83_v4 = vrot.slane %v82_v2, 1 }
 0x19e   :  { %v148_v11 = vrot.slane %v147_v49, 1 }
 0x19f   :  { %v84_v20 = vadd.f32 %v83_v4, %v82_v2  ;;  %v133_v33 = vadd.f32 %v132_v56, %v131_v19 }
 0x1a0   :  { %v149_v21 = vadd.f32 %v148_v11, %v147_v49 }
 0x1a1   :  { %876 = vpush %v84_v20  ;;  %v134_v60 = vrot.slane %v133_v33, 1 }
 0x1a2   :  { %878 = vpush %v99_v42 }
 0x1a3   :  { %v135_v52 = vadd.f32 %v134_v60, %v133_v33 }
 0x1a5   :  { %880 = vpush %v135_v52 }
 0x1a6   :  { %882 = vpush %v149_v21 }
 0x1d2   :  { %s877_s11 = spop %876 }
 0x1d3   :  { %s879_s12 = spop %878  ;;  %s88_s16 = smul.f32 0.125, %s877_s11 }
 0x1d4   :  { %s103_s18 = smul.f32 0.125, %s879_s12 }
 0x1d5   :  { %s809_s19 = smul.f32 0.99, %s88_s16 }
 0x1d6   :  { %s881_s13 = spop %880  ;;  %s814_s24 = smul.f32 0.99, %s103_s18 }
 0x1d7   :  { %s883_s14 = spop %882  ;;  %s139_s17 = smul.f32 0.125, %s881_s13 }
 0x1d8   :  { %s153_s15 = smul.f32 0.125, %s883_s14 }
 0x1d9   :  { %s810_s20 = smul.f32 0.01, %s139_s17 }
 0x1da   :  { %p154_p0 = scmp.ne.f32.partialorder %s153_s15, %s153_s15 }
 0x1db   :  { %s811_s25 = sadd.f32 %s810_s20, %s809_s19 }
 0x1dc   :  { %s1929_s15 = smov (%p154_p0, %s153_s15), 0.0 }
 0x1dd   :  { %s815_s21 = smul.f32 0.01, %s1929_s15 }
 0x1df   :  { %s816_s27 = sadd.f32 %s815_s21, %s814_s24 }
 0x213   :  { %v798_v58 = vpop.xlane.xlu1 %797 }
 0x214   :  { %v799_v34 = vrot.slane %v798_v58, 4 }
 0x216   :  { %v800_v50 = vadd.f32 %v799_v34, %v798_v58 }
 0x218   :  { %v801_v15 = vrot.slane %v800_v50, 2 }
 0x21a   :  { %v802_v29 = vadd.f32 %v801_v15, %v800_v50 }
 0x21c   :  { %v803_v23 = vrot.slane %v802_v29, 1 }
 0x21e   :  { %v804_v18 = vadd.f32 %v803_v23, %v802_v29 }
 0x220   :  { %884 = vpush %v804_v18 }
 0x251   :  { %s885_s22 = spop %884 }
 0x252   :  { %s808_s23 = smul.f32 0.01, %s885_s22 }
 0x254   :  { %s812_s26 = smul.f32 0.99, %s808_s23 }
 0x256   :  { %s813_s28 = sadd.f32 %s812_s26, %s811_s25 }
 0x257   :  { %s817_s29 = sadd.f32 %s816_s27, %s812_s26 }
 0x258   :  { %v822_v51 = vstv %s813_s28 }
 0x259   :  { %v820_v25 = vstv %s817_s29 }
 0x25a   :  { %v821_v40 = vsel %vm819_vm4, %v820_v25, 0.0 }
 0x25b   :  { %v823_v47 = vsel %vm818_vm3, %v822_v51, %v821_v40 }
 0x25c   :  { %824 = vst [vmem:[%s1818_s1] sm:$0x1] %v823_v47 }

</bundles_post_ra>
